<compile_context>
chip_gen: v7x
topology: tpu7x:2x2x1
jax: 0.10.0
libtpu: 0.0.40
codegen_flags: <defaults>
</compile_context>

<pallas_src>
import functools

import jax
import jax.numpy as jnp
from jax import lax
from jax.experimental import pallas as pl
from jax.experimental.pallas import tpu as pltpu

EPS = 1e-6


# ---------------------------------------------------------------------------
# VMEM planning (generation- and dtype-aware tile sizing)
# ---------------------------------------------------------------------------

def _vmem_plan():
    """Returns (total double-buffered block-byte budget, vmem_limit_bytes or None)."""
    try:
        phys = int(pltpu.get_tpu_info().vmem_capacity_bytes)
    except Exception:
        phys = 64 << 20
    if phys >= (100 << 20):          # v5e / v6e: 128 MiB physical VMEM
        return 24 << 20, 64 << 20    # larger tiles, raise the scoped limit
    return 12 << 20, None            # v7x (64 MiB physical): stay inside the default


_BLOCK_BUDGET_BYTES, _VMEM_LIMIT_BYTES = _vmem_plan()


def _row_tile(n_rows, per_row_bytes, cap=4096):
    """Largest row tile (multiple of 8, or the full extent) fitting the budget."""
    rows = _BLOCK_BUDGET_BYTES // max(per_row_bytes, 1)
    rows = min(int(rows), cap)
    rows = max(8, (rows // 8) * 8)
    if rows >= n_rows:
        return n_rows
    return rows


# ---------------------------------------------------------------------------
# RoPE tables: fold freqs_cis [.., L, D/2, 2, 2] into two (L, D) tables so that
#   out = A * x + B * swap_pairs(x)        (swap_pairs swaps even/odd lanes)
# ---------------------------------------------------------------------------

def _rope_tables(pe):
    fc = pe.reshape(pe.shape[-4:]).astype(jnp.float32)      # (L, D/2, 2, 2)
    L, half = fc.shape[0], fc.shape[1]
    a = jnp.stack([fc[:, :, 0, 0], fc[:, :, 1, 1]], axis=-1).reshape(L, 2 * half)
    b = jnp.stack([fc[:, :, 0, 1], fc[:, :, 1, 0]], axis=-1).reshape(L, 2 * half)
    return a, b


# ---------------------------------------------------------------------------
# Kernel 1: fused per-head Q/K RMSNorm + RoPE
# ---------------------------------------------------------------------------

def _qk_norm_rope_kernel(q_ref, k_ref, wq_ref, wk_ref, ra_ref, rb_ref,
                         qo_ref, ko_ref, *, inv_d):
    # q_ref/k_ref/ra_ref/rb_ref/qo_ref/ko_ref: (tl, D); wq_ref/wk_ref: (1, D)
    q = q_ref[...].astype(jnp.float32)
    k = k_ref[...].astype(jnp.float32)
    wq = wq_ref[...].astype(jnp.float32)
    wk = wk_ref[...].astype(jnp.float32)
    ra = ra_ref[...].astype(jnp.float32)
    rb = rb_ref[...].astype(jnp.float32)

    q_ms = jnp.sum(q * q, axis=-1, keepdims=True) * inv_d
    k_ms = jnp.sum(k * k, axis=-1, keepdims=True) * inv_d
    qn = q * lax.rsqrt(q_ms + EPS) * wq
    kn = k * lax.rsqrt(k_ms + EPS) * wk

    d = qn.shape[-1]
    lane = lax.broadcasted_iota(jnp.int32, qn.shape, 1)
    even = (lane % 2) == 0

    def _swap_pairs(t):
        # swap(x)[2i] = x[2i+1], swap(x)[2i+1] = x[2i]  (two XLU rolls + select)
        return jnp.where(even,
                         pltpu.roll(t, shift=d - 1, axis=1),
                         pltpu.roll(t, shift=1, axis=1))

    qo_ref[...] = (ra * qn + rb * _swap_pairs(qn)).astype(qo_ref.dtype)
    ko_ref[...] = (ra * kn + rb * _swap_pairs(kn)).astype(ko_ref.dtype)


def qk_norm_rope_pallas(qkv, q_w, k_w, rope_a, rope_b, num_heads):
    """Per-head RMSNorm + RoPE on the [B, L, 3*H*D] QKV slab.

    Returns q, k, v in [B, L, H, D] layout (only free reshapes downstream)."""
    B, L, three_hd = qkv.shape
    HD = three_hd // 3
    H = num_heads
    D = HD // H
    v = qkv[..., 2 * HD:].reshape(B, L, H, D)

    if D % 128 != 0:
        # TODO(synk): lane-dense multi-head-per-block layout for head_dim < 128.
        def _rope(x32):
            x_sw = x32.reshape(x32.shape[:-1] + (D // 2, 2))[..., ::-1].reshape(x32.shape)
            return rope_a[None, :, None, :] * x32 + rope_b[None, :, None, :] * x_sw
        q32 = qkv[..., :HD].reshape(B, L, H, D).astype(jnp.float32)
        k32 = qkv[..., HD:2 * HD].reshape(B, L, H, D).astype(jnp.float32)
        q32 = q32 * lax.rsqrt(jnp.mean(q32 * q32, -1, keepdims=True) + EPS) * q_w
        k32 = k32 * lax.rsqrt(jnp.mean(k32 * k32, -1, keepdims=True) + EPS) * k_w
        return _rope(q32).astype(v.dtype), _rope(k32).astype(v.dtype), v

    itemsize = jnp.dtype(qkv.dtype).itemsize
    # per row: q,k in + q,k out (input dtype) + two f32 rope rows, double-buffered
    per_row = 2 * D * (4 * itemsize + 8)
    tl = _row_tile(L, per_row)
    nlb = pl.cdiv(L, tl)

    kernel = functools.partial(_qk_norm_rope_kernel, inv_d=1.0 / D)
    q_out, k_out = pl.pallas_call(
        kernel,
        out_shape=(
            jax.ShapeDtypeStruct((B, L, HD), qkv.dtype),
            jax.ShapeDtypeStruct((B, L, HD), qkv.dtype),
        ),
        grid_spec=pltpu.PrefetchScalarGridSpec(
            num_scalar_prefetch=0,
            grid=(B, H, nlb),
            in_specs=[
                pl.BlockSpec((None, tl, D), lambda b, h, l: (b, l, h)),      # q slice of slab
                pl.BlockSpec((None, tl, D), lambda b, h, l: (b, l, H + h)),  # k slice of slab
                pl.BlockSpec((1, D), lambda b, h, l: (0, 0)),                # q norm weight
                pl.BlockSpec((1, D), lambda b, h, l: (0, 0)),                # k norm weight
                pl.BlockSpec((tl, D), lambda b, h, l: (l, 0)),               # rope A
                pl.BlockSpec((tl, D), lambda b, h, l: (l, 0)),               # rope B
            ],
            out_specs=[
                pl.BlockSpec((None, tl, D), lambda b, h, l: (b, l, h)),
                pl.BlockSpec((None, tl, D), lambda b, h, l: (b, l, h)),
            ],
        ),
        compiler_params=pltpu.CompilerParams(
            dimension_semantics=("parallel", "parallel", "parallel"),
            vmem_limit_bytes=_VMEM_LIMIT_BYTES,
        ),
    )(qkv, qkv, q_w.reshape(1, D), k_w.reshape(1, D), rope_a, rope_b)

    return q_out.reshape(B, L, H, D), k_out.reshape(B, L, H, D), v


# ---------------------------------------------------------------------------
# Kernel 2: fused LayerNorm (no affine) + modulation  ((1+scale)*LN(x) + shift)
# ---------------------------------------------------------------------------

def _ln_modulate_kernel(x_ref, shift_ref, scale_ref, o_ref, *, inv_d):
    # x_ref/o_ref: (tl, H)   shift/scale: (1, H)
    x = x_ref[...].astype(jnp.float32)
    mu = jnp.sum(x, axis=-1, keepdims=True) * inv_d
    xc = x - mu
    var = jnp.sum(xc * xc, axis=-1, keepdims=True) * inv_d
    y = xc * lax.rsqrt(var + EPS)
    shift = shift_ref[...].astype(jnp.float32)
    scale = scale_ref[...].astype(jnp.float32)
    o_ref[...] = ((1.0 + scale) * y + shift).astype(o_ref.dtype)


def layernorm_modulate_pallas(x, shift, scale):
    B, L, H = x.shape
    shift3 = shift.reshape(B, 1, H)
    scale3 = scale.reshape(B, 1, H)

    itemsize = jnp.dtype(x.dtype).itemsize
    per_row = 4 * H * itemsize          # in + out, double-buffered
    tl = _row_tile(L, per_row)
    nlb = pl.cdiv(L, tl)

    kernel = functools.partial(_ln_modulate_kernel, inv_d=1.0 / H)
    return pl.pallas_call(
        kernel,
        out_shape=jax.ShapeDtypeStruct((B, L, H), x.dtype),
        grid_spec=pltpu.PrefetchScalarGridSpec(
            num_scalar_prefetch=0,
            grid=(B, nlb),
            in_specs=[
                pl.BlockSpec((None, tl, H), lambda b, l: (b, l, 0)),
                pl.BlockSpec((None, 1, H), lambda b, l: (b, 0, 0)),
                pl.BlockSpec((None, 1, H), lambda b, l: (b, 0, 0)),
            ],
            out_specs=pl.BlockSpec((None, tl, H), lambda b, l: (b, l, 0)),
        ),
        compiler_params=pltpu.CompilerParams(
            dimension_semantics=("parallel", "parallel"),
            vmem_limit_bytes=_VMEM_LIMIT_BYTES,
        ),
    )(x, shift3, scale3)


# ---------------------------------------------------------------------------
# Attention / plumbing (matmuls + softmax stay in XLA; f32 accumulation only)
# ---------------------------------------------------------------------------

def attention_blhd(q, k, v):
    # TODO(synk): replace with a fused flash-attention Pallas kernel.
    D = q.shape[-1]
    scale = 1.0 / (D ** 0.5)
    logits = jnp.einsum("blhd,bmhd->bhlm", q, k,
                        preferred_element_type=jnp.float32) * scale
    probs = jax.nn.softmax(logits, axis=-1).astype(v.dtype)
    out = jnp.einsum("bhlm,bmhd->blhd", probs, v,
                     preferred_element_type=jnp.float32).astype(v.dtype)
    B, L, H, Dh = out.shape
    return out.reshape(B, L, H * Dh)


def modulation(key_vec, w, b):
    # Modulation.forward with double=True: Linear(silu(key))[:, None, :].chunk(6)
    out = (jax.nn.silu(key_vec) @ w + b)[:, None, :]
    c = jnp.split(out, 6, axis=-1)
    return (c[0], c[1], c[2]), (c[3], c[4], c[5])  # (shift, scale, gate) x2


# ---------------------------------------------------------------------------
# Pure-JAX reference pieces (match the PyTorch formulation exactly)
# ---------------------------------------------------------------------------

def _rmsnorm_ref(x, w):
    x32 = x.astype(jnp.float32)
    ms = jnp.mean(x32 * x32, axis=-1, keepdims=True)
    return x32 * lax.rsqrt(ms + EPS) * w.astype(jnp.float32)


def _layernorm_modulate_ref(x, shift, scale):
    x32 = x.astype(jnp.float32)
    mu = jnp.mean(x32, axis=-1, keepdims=True)
    var = jnp.mean((x32 - mu) ** 2, axis=-1, keepdims=True)
    y = (x32 - mu) * lax.rsqrt(var + EPS)
    return ((1.0 + scale.astype(jnp.float32)) * y
            + shift.astype(jnp.float32)).astype(x.dtype)


def apply_rope_ref(xq, xk, freqs_cis):
    B, H, L, D = xq.shape
    xq_ = xq.astype(jnp.float32).reshape(B, H, L, D // 2, 1, 2)
    xk_ = xk.astype(jnp.float32).reshape(B, H, L, D // 2, 1, 2)
    xq_out = freqs_cis[..., 0] * xq_[..., 0] + freqs_cis[..., 1] * xq_[..., 1]
    xk_out = freqs_cis[..., 0] * xk_[..., 0] + freqs_cis[..., 1] * xk_[..., 1]
    return (xq_out.reshape(B, H, L, D).astype(xq.dtype),
            xk_out.reshape(B, H, L, D).astype(xk.dtype))


def attention_ref(q, k, v, pe):
    q, k = apply_rope_ref(q, k, pe)
    D = q.shape[-1]
    scale = 1.0 / (D ** 0.5)
    logits = jnp.einsum("bhqd,bhkd->bhqk",
                        q.astype(jnp.float32), k.astype(jnp.float32)) * scale
    probs = jax.nn.softmax(logits, axis=-1).astype(v.dtype)
    out = jnp.einsum("bhqk,bhkd->bhqd", probs, v)
    B, H, L, Dh = out.shape
    return out.transpose(0, 2, 1, 3).reshape(B, L, H * Dh)


def _split_qkv(qkv, num_heads):
    B, L, three_hd = qkv.shape
    D = three_hd // (3 * num_heads)
    qkv = qkv.reshape(B, L, 3, num_heads, D).transpose(2, 0, 3, 1, 4)
    return qkv[0], qkv[1], qkv[2]  # each [B, H, L, D]


# ---------------------------------------------------------------------------
# DoubleStreamBlock forward
# ---------------------------------------------------------------------------

def double_stream_block(p, x, wm, key_vec, pe, *, num_heads, use_pallas=True):
    ln_mod = layernorm_modulate_pallas if use_pallas else _layernorm_modulate_ref

    x_mod1, x_mod2 = modulation(key_vec, p["x_mod_w"], p["x_mod_b"])
    wm_mod1, wm_mod2 = modulation(key_vec, p["wm_mod_w"], p["wm_mod_b"])
    Lw, Lx = wm.shape[1], x.shape[1]

    x_modulated = ln_mod(x, x_mod1[0], x_mod1[1])
    wm_modulated = ln_mod(wm, wm_mod1[0], wm_mod1[1])
    x_qkv = x_modulated @ p["x_qkv_w"] + p["x_qkv_b"]
    wm_qkv = wm_modulated @ p["wm_qkv_w"] + p["wm_qkv_b"]

    if use_pallas:
        rope_a, rope_b = _rope_tables(pe)                       # (L_total, D)
        xq, xk, xv = qk_norm_rope_pallas(
            x_qkv, p["x_qnorm_w"], p["x_knorm_w"],
            rope_a[Lw:Lw + Lx], rope_b[Lw:Lw + Lx], num_heads)
        wq, wk, wv = qk_norm_rope_pallas(
            wm_qkv, p["wm_qnorm_w"], p["wm_knorm_w"],
            rope_a[:Lw], rope_b[:Lw], num_heads)
        q = jnp.concatenate([wq, xq], axis=1)                   # [B, L_total, H, D]
        k = jnp.concatenate([wk, xk], axis=1)
        v = jnp.concatenate([wv, xv], axis=1)
        attn = attention_blhd(q, k, v)
    else:
        xq, xk, xv = _split_qkv(x_qkv, num_heads)
        xq = _rmsnorm_ref(xq, p["x_qnorm_w"]).astype(xv.dtype)
        xk = _rmsnorm_ref(xk, p["x_knorm_w"]).astype(xv.dtype)
        wq, wk, wv = _split_qkv(wm_qkv, num_heads)
        wq = _rmsnorm_ref(wq, p["wm_qnorm_w"]).astype(wv.dtype)
        wk = _rmsnorm_ref(wk, p["wm_knorm_w"]).astype(wv.dtype)
        q = jnp.concatenate([wq, xq], axis=2)
        k = jnp.concatenate([wk, xk], axis=2)
        v = jnp.concatenate([wv, xv], axis=2)
        attn = attention_ref(q, k, v, pe)

    wm_attn, s_attn = attn[:, :Lw], attn[:, Lw:]

    x = x + x_mod1[2] * (s_attn @ p["x_proj_w"] + p["x_proj_b"])
    x_h = jax.nn.gelu(ln_mod(x, x_mod2[0], x_mod2[1]) @ p["x_mlp_w1"] + p["x_mlp_b1"],
                      approximate=True)
    x = x + x_mod2[2] * (x_h @ p["x_mlp_w2"] + p["x_mlp_b2"])

    wm = wm + wm_mod1[2] * (wm_attn @ p["wm_proj_w"] + p["wm_proj_b"])
    wm_h = jax.nn.gelu(ln_mod(wm, wm_mod2[0], wm_mod2[1]) @ p["wm_mlp_w1"] + p["wm_mlp_b1"],
                       approximate=True)
    wm = wm + wm_mod2[2] * (wm_h @ p["wm_mlp_w2"] + p["wm_mlp_b2"])
    return x, wm


# ---------------------------------------------------------------------------
# Test harness
# ---------------------------------------------------------------------------

if __name__ == "__main__":
    B, Lx, Lw = 2, 16, 8
    hidden, heads, mlp_ratio = 256, 2, 4.0
    D = hidden // heads
    mlp_hidden = int(hidden * mlp_ratio)

    root = jax.random.PRNGKey(0)
    keys = iter(jax.random.split(root, 40))

    def nrm(shape, scale=0.02):
        return (scale * jax.random.normal(next(keys), shape)).astype(jnp.float32)

    def make_branch(prefix):
        return {
            prefix + "_mod_w": nrm((hidden, 6 * hidden)),
            prefix + "_mod_b": nrm((6 * hidden,)),
            prefix + "_qkv_w": nrm((hidden, 3 * hidden)),
            prefix + "_qkv_b": nrm((3 * hidden,)),
            prefix + "_qnorm_w": jnp.ones((D,), jnp.float32) + 0.05 * jax.random.normal(next(keys), (D,)),
            prefix + "_knorm_w": jnp.ones((D,), jnp.float32) + 0.05 * jax.random.normal(next(keys), (D,)),
            prefix + "_proj_w": nrm((hidden, hidden)),
            prefix + "_proj_b": nrm((hidden,)),
            prefix + "_mlp_w1": nrm((hidden, mlp_hidden)),
            prefix + "_mlp_b1": nrm((mlp_hidden,)),
            prefix + "_mlp_w2": nrm((mlp_hidden, hidden)),
            prefix + "_mlp_b2": nrm((hidden,)),
        }

    params = {}
    params.update(make_branch("x"))
    params.update(make_branch("wm"))

    x = jax.random.normal(next(keys), (B, Lx, hidden), dtype=jnp.float32)
    wm = jax.random.normal(next(keys), (B, Lw, hidden), dtype=jnp.float32)
    key_vec = jax.random.normal(next(keys), (B, hidden), dtype=jnp.float32)

    # Rotary position embedding table: [1, 1, L_total, D/2, 2, 2]
    L_total = Lw + Lx
    pos = jnp.arange(L_total, dtype=jnp.float32)
    freqs = 1.0 / (10000.0 ** (jnp.arange(0, D, 2, dtype=jnp.float32) / D))
    ang = pos[:, None] * freqs[None, :]
    cos, sin = jnp.cos(ang), jnp.sin(ang)
    rot = jnp.stack([jnp.stack([cos, -sin], axis=-1),
                     jnp.stack([sin, cos], axis=-1)], axis=-2)  # [L, D/2, 2, 2]
    pe = rot[None, None]  # [1, 1, L, D/2, 2, 2]

    fwd = jax.jit(functools.partial(double_stream_block, num_heads=heads, use_pallas=True))
    x_out, wm_out = fwd(params, x, wm, key_vec, pe)
    x_out = jax.block_until_ready(x_out)
    wm_out = jax.block_until_ready(wm_out)

    # Pure-JAX reference (original PyTorch formulation, no Pallas kernels).
    x_ref, wm_ref = double_stream_block(params, x, wm, key_vec, pe,
                                        num_heads=heads, use_pallas=False)

    assert x_out.shape == x.shape and wm_out.shape == wm.shape
    assert jnp.all(jnp.isfinite(x_out)) and jnp.all(jnp.isfinite(wm_out))
    assert jnp.allclose(x_out, x_ref, atol=1e-2, rtol=1e-2)
    assert jnp.allclose(wm_out, wm_ref, atol=1e-2, rtol=1e-2)

    print("KERNEL_OK")
</pallas_src>

<mosaic_0001>
module attributes {stable_mosaic.version = 11 : i64} {
  func.func @_ln_modulate_kernel(%arg0: i32, %arg1: i32, %arg2: memref<1x8x256xf32, #tpu.memory_space<vmem>>, %arg3: memref<1x1x256xf32, #tpu.memory_space<vmem>>, %arg4: memref<1x1x256xf32, #tpu.memory_space<vmem>>, %arg5: memref<1x8x256xf32, #tpu.memory_space<vmem>>) attributes {dimension_semantics = [#tpu.dimension_semantics<parallel>, #tpu.dimension_semantics<parallel>], iteration_bounds = array<i64: 2, 1>, scalar_prefetch = 0 : i64, scratch_operands = 0 : i64, tpu.core_type = #tpu.core_type<tc>, window_params = [{transform_indices = @transform_0, window_bounds = array<i64: 1, 8, 256>}, {transform_indices = @transform_1, window_bounds = array<i64: 1, 1, 256>}, {transform_indices = @transform_2, window_bounds = array<i64: 1, 1, 256>}, {transform_indices = @transform_3, window_bounds = array<i64: 1, 8, 256>}]} {
    %c0 = arith.constant 0 : index
    %c0_0 = arith.constant 0 : index
    %c0_1 = arith.constant 0 : index
    %0 = vector.load %arg2[%c0, %c0_0, %c0_1] : memref<1x8x256xf32, #tpu.memory_space<vmem>>, vector<1x8x256xf32>
    %1 = vector.shape_cast %0 : vector<1x8x256xf32> to vector<8x256xf32>
    %cst = arith.constant dense<0.000000e+00> : vector<8xf32>
    %2 = vector.multi_reduction <add>, %1, %cst [1] : vector<8x256xf32> to vector<8xf32>
    %3 = vector.shape_cast %2 : vector<8xf32> to vector<8x1xf32>
    %cst_2 = arith.constant 3.906250e-03 : f32
    %4 = vector.broadcast %cst_2 : f32 to vector<8x1xf32>
    %5 = arith.mulf %3, %4 : vector<8x1xf32>
    %6 = vector.broadcast %5 : vector<8x1xf32> to vector<8x256xf32>
    %7 = arith.subf %1, %6 : vector<8x256xf32>
    %8 = arith.mulf %7, %7 : vector<8x256xf32>
    %cst_3 = arith.constant dense<0.000000e+00> : vector<8xf32>
    %9 = vector.multi_reduction <add>, %8, %cst_3 [1] : vector<8x256xf32> to vector<8xf32>
    %10 = vector.shape_cast %9 : vector<8xf32> to vector<8x1xf32>
    %cst_4 = arith.constant 3.906250e-03 : f32
    %11 = vector.broadcast %cst_4 : f32 to vector<8x1xf32>
    %12 = arith.mulf %10, %11 : vector<8x1xf32>
    %cst_5 = arith.constant 9.99999997E-7 : f32
    %13 = vector.broadcast %cst_5 : f32 to vector<8x1xf32>
    %14 = arith.addf %12, %13 : vector<8x1xf32>
    %15 = math.rsqrt %14 : vector<8x1xf32>
    %16 = vector.broadcast %15 : vector<8x1xf32> to vector<8x256xf32>
    %17 = arith.mulf %7, %16 : vector<8x256xf32>
    %c0_6 = arith.constant 0 : index
    %c0_7 = arith.constant 0 : index
    %c0_8 = arith.constant 0 : index
    %18 = vector.load %arg3[%c0_6, %c0_7, %c0_8] : memref<1x1x256xf32, #tpu.memory_space<vmem>>, vector<1x1x256xf32>
    %19 = vector.shape_cast %18 : vector<1x1x256xf32> to vector<1x256xf32>
    %c0_9 = arith.constant 0 : index
    %c0_10 = arith.constant 0 : index
    %c0_11 = arith.constant 0 : index
    %20 = vector.load %arg4[%c0_9, %c0_10, %c0_11] : memref<1x1x256xf32, #tpu.memory_space<vmem>>, vector<1x1x256xf32>
    %21 = vector.shape_cast %20 : vector<1x1x256xf32> to vector<1x256xf32>
    %cst_12 = arith.constant 1.000000e+00 : f32
    %22 = vector.broadcast %cst_12 : f32 to vector<1x256xf32>
    %23 = arith.addf %22, %21 : vector<1x256xf32>
    %24 = vector.broadcast %23 : vector<1x256xf32> to vector<8x256xf32>
    %25 = arith.mulf %24, %17 : vector<8x256xf32>
    %26 = vector.broadcast %19 : vector<1x256xf32> to vector<8x256xf32>
    %27 = arith.addf %25, %26 : vector<8x256xf32>
    %c0_13 = arith.constant 0 : index
    %c0_14 = arith.constant 0 : index
    %c0_15 = arith.constant 0 : index
    %28 = vector.load %arg5[%c0_13, %c0_14, %c0_15] : memref<1x8x256xf32, #tpu.memory_space<vmem>>, vector<1x8x256xf32>
    %29 = vector.shape_cast %28 : vector<1x8x256xf32> to vector<8x256xf32>
    %30 = vector.shape_cast %27 : vector<8x256xf32> to vector<1x8x256xf32>
    tpu.vector_store %arg5[%c0_13, %c0_14, %c0_15], %30 {strides = array<i32>} : memref<1x8x256xf32, #tpu.memory_space<vmem>>, vector<1x8x256xf32>,
    return
  }
  func.func @transform_0(%arg0: i32, %arg1: i32) -> (i32, i32, i32) {
    %c0_i32 = arith.constant 0 : i32
    %c0_i32_0 = arith.constant 0 : i32
    return %arg0, %arg1, %c0_i32 : i32, i32, i32
  }
  func.func @transform_1(%arg0: i32, %arg1: i32) -> (i32, i32, i32) {
    %c0_i32 = arith.constant 0 : i32
    %c0_i32_0 = arith.constant 0 : i32
    %c0_i32_1 = arith.constant 0 : i32
    return %arg0, %c0_i32, %c0_i32_0 : i32, i32, i32
  }
  func.func @transform_2(%arg0: i32, %arg1: i32) -> (i32, i32, i32) {
    %c0_i32 = arith.constant 0 : i32
    %c0_i32_0 = arith.constant 0 : i32
    %c0_i32_1 = arith.constant 0 : i32
    return %arg0, %c0_i32, %c0_i32_0 : i32, i32, i32
  }
  func.func @transform_3(%arg0: i32, %arg1: i32) -> (i32, i32, i32) {
    %c0_i32 = arith.constant 0 : i32
    %c0_i32_0 = arith.constant 0 : i32
    return %arg0, %arg1, %c0_i32 : i32, i32, i32
  }
}

module attributes {stable_mosaic.version = 11 : i64} {
  func.func @_ln_modulate_kernel(%arg0: i32, %arg1: i32, %arg2: memref<1x16x256xf32, #tpu.memory_space<vmem>>, %arg3: memref<1x1x256xf32, #tpu.memory_space<vmem>>, %arg4: memref<1x1x256xf32, #tpu.memory_space<vmem>>, %arg5: memref<1x16x256xf32, #tpu.memory_space<vmem>>) attributes {dimension_semantics = [#tpu.dimension_semantics<parallel>, #tpu.dimension_semantics<parallel>], iteration_bounds = array<i64: 2, 1>, scalar_prefetch = 0 : i64, scratch_operands = 0 : i64, tpu.core_type = #tpu.core_type<tc>, window_params = [{transform_indices = @transform_0, window_bounds = array<i64: 1, 16, 256>}, {transform_indices = @transform_1, window_bounds = array<i64: 1, 1, 256>}, {transform_indices = @transform_2, window_bounds = array<i64: 1, 1, 256>}, {transform_indices = @transform_3, window_bounds = array<i64: 1, 16, 256>}]} {
    %c0 = arith.constant 0 : index
    %c0_0 = arith.constant 0 : index
    %c0_1 = arith.constant 0 : index
    %0 = vector.load %arg2[%c0, %c0_0, %c0_1] : memref<1x16x256xf32, #tpu.memory_space<vmem>>, vector<1x16x256xf32>
    %1 = vector.shape_cast %0 : vector<1x16x256xf32> to vector<16x256xf32>
    %cst = arith.constant dense<0.000000e+00> : vector<16xf32>
    %2 = vector.multi_reduction <add>, %1, %cst [1] : vector<16x256xf32> to vector<16xf32>
    %3 = vector.shape_cast %2 : vector<16xf32> to vector<16x1xf32>
    %cst_2 = arith.constant 3.906250e-03 : f32
    %4 = vector.broadcast %cst_2 : f32 to vector<16x1xf32>
    %5 = arith.mulf %3, %4 : vector<16x1xf32>
    %6 = vector.broadcast %5 : vector<16x1xf32> to vector<16x256xf32>
    %7 = arith.subf %1, %6 : vector<16x256xf32>
    %8 = arith.mulf %7, %7 : vector<16x256xf32>
    %cst_3 = arith.constant dense<0.000000e+00> : vector<16xf32>
    %9 = vector.multi_reduction <add>, %8, %cst_3 [1] : vector<16x256xf32> to vector<16xf32>
    %10 = vector.shape_cast %9 : vector<16xf32> to vector<16x1xf32>
    %cst_4 = arith.constant 3.906250e-03 : f32
    %11 = vector.broadcast %cst_4 : f32 to vector<16x1xf32>
    %12 = arith.mulf %10, %11 : vector<16x1xf32>
    %cst_5 = arith.constant 9.99999997E-7 : f32
    %13 = vector.broadcast %cst_5 : f32 to vector<16x1xf32>
    %14 = arith.addf %12, %13 : vector<16x1xf32>
    %15 = math.rsqrt %14 : vector<16x1xf32>
    %16 = vector.broadcast %15 : vector<16x1xf32> to vector<16x256xf32>
    %17 = arith.mulf %7, %16 : vector<16x256xf32>
    %c0_6 = arith.constant 0 : index
    %c0_7 = arith.constant 0 : index
    %c0_8 = arith.constant 0 : index
    %18 = vector.load %arg3[%c0_6, %c0_7, %c0_8] : memref<1x1x256xf32, #tpu.memory_space<vmem>>, vector<1x1x256xf32>
    %19 = vector.shape_cast %18 : vector<1x1x256xf32> to vector<1x256xf32>
    %c0_9 = arith.constant 0 : index
    %c0_10 = arith.constant 0 : index
    %c0_11 = arith.constant 0 : index
    %20 = vector.load %arg4[%c0_9, %c0_10, %c0_11] : memref<1x1x256xf32, #tpu.memory_space<vmem>>, vector<1x1x256xf32>
    %21 = vector.shape_cast %20 : vector<1x1x256xf32> to vector<1x256xf32>
    %cst_12 = arith.constant 1.000000e+00 : f32
    %22 = vector.broadcast %cst_12 : f32 to vector<1x256xf32>
    %23 = arith.addf %22, %21 : vector<1x256xf32>
    %24 = vector.broadcast %23 : vector<1x256xf32> to vector<16x256xf32>
    %25 = arith.mulf %24, %17 : vector<16x256xf32>
    %26 = vector.broadcast %19 : vector<1x256xf32> to vector<16x256xf32>
    %27 = arith.addf %25, %26 : vector<16x256xf32>
    %c0_13 = arith.constant 0 : index
    %c0_14 = arith.constant 0 : index
    %c0_15 = arith.constant 0 : index
    %28 = vector.load %arg5[%c0_13, %c0_14, %c0_15] : memref<1x16x256xf32, #tpu.memory_space<vmem>>, vector<1x16x256xf32>
    %29 = vector.shape_cast %28 : vector<1x16x256xf32> to vector<16x256xf32>
    %30 = vector.shape_cast %27 : vector<16x256xf32> to vector<1x16x256xf32>
    tpu.vector_store %arg5[%c0_13, %c0_14, %c0_15], %30 {strides = array<i32>} : memref<1x16x256xf32, #tpu.memory_space<vmem>>, vector<1x16x256xf32>,
    return
  }
  func.func @transform_0(%arg0: i32, %arg1: i32) -> (i32, i32, i32) {
    %c0_i32 = arith.constant 0 : i32
    %c0_i32_0 = arith.constant 0 : i32
    return %arg0, %arg1, %c0_i32 : i32, i32, i32
  }
  func.func @transform_1(%arg0: i32, %arg1: i32) -> (i32, i32, i32) {
    %c0_i32 = arith.constant 0 : i32
    %c0_i32_0 = arith.constant 0 : i32
    %c0_i32_1 = arith.constant 0 : i32
    return %arg0, %c0_i32, %c0_i32_0 : i32, i32, i32
  }
  func.func @transform_2(%arg0: i32, %arg1: i32) -> (i32, i32, i32) {
    %c0_i32 = arith.constant 0 : i32
    %c0_i32_0 = arith.constant 0 : i32
    %c0_i32_1 = arith.constant 0 : i32
    return %arg0, %c0_i32, %c0_i32_0 : i32, i32, i32
  }
  func.func @transform_3(%arg0: i32, %arg1: i32) -> (i32, i32, i32) {
    %c0_i32 = arith.constant 0 : i32
    %c0_i32_0 = arith.constant 0 : i32
    return %arg0, %arg1, %c0_i32 : i32, i32, i32
  }
}

module attributes {stable_mosaic.version = 11 : i64} {
  func.func @_qk_norm_rope_kernel(%arg0: i32, %arg1: i32, %arg2: i32, %arg3: memref<1x8x128xf32, #tpu.memory_space<vmem>>, %arg4: memref<1x8x128xf32, #tpu.memory_space<vmem>>, %arg5: memref<1x128xf32, #tpu.memory_space<vmem>>, %arg6: memref<1x128xf32, #tpu.memory_space<vmem>>, %arg7: memref<8x128xf32, #tpu.memory_space<vmem>>, %arg8: memref<8x128xf32, #tpu.memory_space<vmem>>, %arg9: memref<1x8x128xf32, #tpu.memory_space<vmem>>, %arg10: memref<1x8x128xf32, #tpu.memory_space<vmem>>) attributes {dimension_semantics = [#tpu.dimension_semantics<parallel>, #tpu.dimension_semantics<parallel>, #tpu.dimension_semantics<parallel>], iteration_bounds = array<i64: 2, 2, 1>, scalar_prefetch = 0 : i64, scratch_operands = 0 : i64, tpu.core_type = #tpu.core_type<tc>, window_params = [{transform_indices = @transform_0, window_bounds = array<i64: 1, 8, 128>}, {transform_indices = @transform_1, window_bounds = array<i64: 1, 8, 128>}, {pipeline_mode = #tpu.pipeline_mode<synchronous>, transform_indices = @transform_2, window_bounds = array<i64: 1, 128>}, {pipeline_mode = #tpu.pipeline_mode<synchronous>, transform_indices = @transform_3, window_bounds = array<i64: 1, 128>}, {transform_indices = @transform_4, window_bounds = array<i64: 8, 128>}, {transform_indices = @transform_5, window_bounds = array<i64: 8, 128>}, {transform_indices = @transform_6, window_bounds = array<i64: 1, 8, 128>}, {transform_indices = @transform_7, window_bounds = array<i64: 1, 8, 128>}]} {
    %c0 = arith.constant 0 : index
    %c0_0 = arith.constant 0 : index
    %c0_1 = arith.constant 0 : index
    %0 = vector.load %arg3[%c0, %c0_0, %c0_1] : memref<1x8x128xf32, #tpu.memory_space<vmem>>, vector<1x8x128xf32>
    %1 = vector.shape_cast %0 : vector<1x8x128xf32> to vector<8x128xf32>
    %c0_2 = arith.constant 0 : index
    %c0_3 = arith.constant 0 : index
    %c0_4 = arith.constant 0 : index
    %2 = vector.load %arg4[%c0_2, %c0_3, %c0_4] : memref<1x8x128xf32, #tpu.memory_space<vmem>>, vector<1x8x128xf32>
    %3 = vector.shape_cast %2 : vector<1x8x128xf32> to vector<8x128xf32>
    %c0_5 = arith.constant 0 : index
    %c0_6 = arith.constant 0 : index
    %4 = vector.load %arg5[%c0_5, %c0_6] : memref<1x128xf32, #tpu.memory_space<vmem>>, vector<1x128xf32>
    %c0_7 = arith.constant 0 : index
    %c0_8 = arith.constant 0 : index
    %5 = vector.load %arg6[%c0_7, %c0_8] : memref<1x128xf32, #tpu.memory_space<vmem>>, vector<1x128xf32>
    %c0_9 = arith.constant 0 : index
    %c0_10 = arith.constant 0 : index
    %6 = vector.load %arg7[%c0_9, %c0_10] : memref<8x128xf32, #tpu.memory_space<vmem>>, vector<8x128xf32>
    %c0_11 = arith.constant 0 : index
    %c0_12 = arith.constant 0 : index
    %7 = vector.load %arg8[%c0_11, %c0_12] : memref<8x128xf32, #tpu.memory_space<vmem>>, vector<8x128xf32>
    %8 = arith.mulf %1, %1 : vector<8x128xf32>
    %cst = arith.constant dense<0.000000e+00> : vector<8xf32>
    %9 = vector.multi_reduction <add>, %8, %cst [1] : vector<8x128xf32> to vector<8xf32>
    %10 = vector.shape_cast %9 : vector<8xf32> to vector<8x1xf32>
    %cst_13 = arith.constant 7.812500e-03 : f32
    %11 = vector.broadcast %cst_13 : f32 to vector<8x1xf32>
    %12 = arith.mulf %10, %11 : vector<8x1xf32>
    %13 = arith.mulf %3, %3 : vector<8x128xf32>
    %cst_14 = arith.constant dense<0.000000e+00> : vector<8xf32>
    %14 = vector.multi_reduction <add>, %13, %cst_14 [1] : vector<8x128xf32> to vector<8xf32>
    %15 = vector.shape_cast %14 : vector<8xf32> to vector<8x1xf32>
    %cst_15 = arith.constant 7.812500e-03 : f32
    %16 = vector.broadcast %cst_15 : f32 to vector<8x1xf32>
    %17 = arith.mulf %15, %16 : vector<8x1xf32>
    %cst_16 = arith.constant 9.99999997E-7 : f32
    %18 = vector.broadcast %cst_16 : f32 to vector<8x1xf32>
    %19 = arith.addf %12, %18 : vector<8x1xf32>
    %20 = math.rsqrt %19 : vector<8x1xf32>
    %21 = vector.broadcast %20 : vector<8x1xf32> to vector<8x128xf32>
    %22 = arith.mulf %1, %21 : vector<8x128xf32>
    %23 = vector.broadcast %4 : vector<1x128xf32> to vector<8x128xf32>
    %24 = arith.mulf %22, %23 : vector<8x128xf32>
    %cst_17 = arith.constant 9.99999997E-7 : f32
    %25 = vector.broadcast %cst_17 : f32 to vector<8x1xf32>
    %26 = arith.addf %17, %25 : vector<8x1xf32>
    %27 = math.rsqrt %26 : vector<8x1xf32>
    %28 = vector.broadcast %27 : vector<8x1xf32> to vector<8x128xf32>
    %29 = arith.mulf %3, %28 : vector<8x128xf32>
    %30 = vector.broadcast %5 : vector<1x128xf32> to vector<8x128xf32>
    %31 = arith.mulf %29, %30 : vector<8x128xf32>
    %32 = tpu.iota {dimensions = array<i32: 1>} : vector<8x128xi32>
    %c2_i32 = arith.constant 2 : i32
    %c0_i32 = arith.constant 0 : i32
    %33 = arith.cmpi eq, %c2_i32, %c0_i32 : i32
    %c1_i32 = arith.constant 1 : i32
    %34 = arith.select %33, %c1_i32, %c2_i32 : i32
    %35 = vector.broadcast %34 : i32 to vector<8x128xi32>
    %36 = arith.remsi %32, %35 : vector<8x128xi32>
    %c0_i32_18 = arith.constant 0 : i32
    %37 = vector.broadcast %c0_i32_18 : i32 to vector<8x128xi32>
    %38 = arith.cmpi ne, %36, %37 : vector<8x128xi32>
    %c0_i32_19 = arith.constant 0 : i32
    %39 = vector.broadcast %c0_i32_19 : i32 to vector<8x128xi32>
    %40 = arith.cmpi slt, %36, %39 : vector<8x128xi32>
    %c0_i32_20 = arith.constant 0 : i32
    %41 = arith.cmpi slt, %34, %c0_i32_20 : i32
    %42 = vector.broadcast %41 : i1 to vector<8x128xi1>
    %43 = vector.broadcast %42 : vector<8x128xi1> to vector<8x128xi1>
    %44 = arith.xori %40, %43 : vector<8x128xi1>
    %45 = arith.andi %44, %38 : vector<8x128xi1>
    %46 = vector.broadcast %34 : i32 to vector<8x128xi32>
    %47 = arith.addi %36, %46 : vector<8x128xi32>
    %48 = arith.select %45, %47, %36 : vector<8x128xi1>, vector<8x128xi32>
    %c0_i32_21 = arith.constant 0 : i32
    %49 = vector.broadcast %c0_i32_21 : i32 to vector<8x128xi32>
    %50 = arith.cmpi eq, %48, %49 : vector<8x128xi32>
    %51 = arith.mulf %6, %24 : vector<8x128xf32>
    %c127_i32 = arith.constant 127 : i32
    %52 = tpu.dynamic_rotate %24 by %c127_i32 dim 1 : vector<8x128xf32>, i32 -> vector<8x128xf32>
    %c1_i32_22 = arith.constant 1 : i32
    %53 = tpu.dynamic_rotate %24 by %c1_i32_22 dim 1 : vector<8x128xf32>, i32 -> vector<8x128xf32>
    %54 = arith.select %50, %52, %53 : vector<8x128xi1>, vector<8x128xf32>
    %55 = arith.mulf %7, %54 : vector<8x128xf32>
    %56 = arith.addf %51, %55 : vector<8x128xf32>
    %c0_23 = arith.constant 0 : index
    %c0_24 = arith.constant 0 : index
    %c0_25 = arith.constant 0 : index
    %57 = vector.load %arg9[%c0_23, %c0_24, %c0_25] : memref<1x8x128xf32, #tpu.memory_space<vmem>>, vector<1x8x128xf32>
    %58 = vector.shape_cast %57 : vector<1x8x128xf32> to vector<8x128xf32>
    %59 = vector.shape_cast %56 : vector<8x128xf32> to vector<1x8x128xf32>
    tpu.vector_store %arg9[%c0_23, %c0_24, %c0_25], %59 {strides = array<i32>} : memref<1x8x128xf32, #tpu.memory_space<vmem>>, vector<1x8x128xf32>,
    %60 = arith.mulf %6, %31 : vector<8x128xf32>
    %c127_i32_26 = arith.constant 127 : i32
    %61 = tpu.dynamic_rotate %31 by %c127_i32_26 dim 1 : vector<8x128xf32>, i32 -> vector<8x128xf32>
    %c1_i32_27 = arith.constant 1 : i32
    %62 = tpu.dynamic_rotate %31 by %c1_i32_27 dim 1 : vector<8x128xf32>, i32 -> vector<8x128xf32>
    %63 = arith.select %50, %61, %62 : vector<8x128xi1>, vector<8x128xf32>
    %64 = arith.mulf %7, %63 : vector<8x128xf32>
    %65 = arith.addf %60, %64 : vector<8x128xf32>
    %c0_28 = arith.constant 0 : index
    %c0_29 = arith.constant 0 : index
    %c0_30 = arith.constant 0 : index
    %66 = vector.load %arg10[%c0_28, %c0_29, %c0_30] : memref<1x8x128xf32, #tpu.memory_space<vmem>>, vector<1x8x128xf32>
    %67 = vector.shape_cast %66 : vector<1x8x128xf32> to vector<8x128xf32>
    %68 = vector.shape_cast %65 : vector<8x128xf32> to vector<1x8x128xf32>
    tpu.vector_store %arg10[%c0_28, %c0_29, %c0_30], %68 {strides = array<i32>} : memref<1x8x128xf32, #tpu.memory_space<vmem>>, vector<1x8x128xf32>,
    return
  }
  func.func @transform_0(%arg0: i32, %arg1: i32, %arg2: i32) -> (i32, i32, i32) {
    %c0_i32 = arith.constant 0 : i32
    return %arg0, %arg2, %arg1 : i32, i32, i32
  }
  func.func @transform_1(%arg0: i32, %arg1: i32, %arg2: i32) -> (i32, i32, i32) {
    %c2_i32 = arith.constant 2 : i32
    %0 = arith.addi %c2_i32, %arg1 : i32
    %c0_i32 = arith.constant 0 : i32
    return %arg0, %arg2, %0 : i32, i32, i32
  }
  func.func @transform_2(%arg0: i32, %arg1: i32, %arg2: i32) -> (i32, i32) {
    %c0_i32 = arith.constant 0 : i32
    %c0_i32_0 = arith.constant 0 : i32
    %c0_i32_1 = arith.constant 0 : i32
    return %c0_i32, %c0_i32_0 : i32, i32
  }
  func.func @transform_3(%arg0: i32, %arg1: i32, %arg2: i32) -> (i32, i32) {
    %c0_i32 = arith.constant 0 : i32
    %c0_i32_0 = arith.constant 0 : i32
    %c0_i32_1 = arith.constant 0 : i32
    return %c0_i32, %c0_i32_0 : i32, i32
  }
  func.func @transform_4(%arg0: i32, %arg1: i32, %arg2: i32) -> (i32, i32) {
    %c0_i32 = arith.constant 0 : i32
    %c0_i32_0 = arith.constant 0 : i32
    return %arg2, %c0_i32 : i32, i32
  }
  func.func @transform_5(%arg0: i32, %arg1: i32, %arg2: i32) -> (i32, i32) {
    %c0_i32 = arith.constant 0 : i32
    %c0_i32_0 = arith.constant 0 : i32
    return %arg2, %c0_i32 : i32, i32
  }
  func.func @transform_6(%arg0: i32, %arg1: i32, %arg2: i32) -> (i32, i32, i32) {
    %c0_i32 = arith.constant 0 : i32
    return %arg0, %arg2, %arg1 : i32, i32, i32
  }
  func.func @transform_7(%arg0: i32, %arg1: i32, %arg2: i32) -> (i32, i32, i32) {
    %c0_i32 = arith.constant 0 : i32
    return %arg0, %arg2, %arg1 : i32, i32, i32
  }
}

module attributes {stable_mosaic.version = 11 : i64} {
  func.func @_qk_norm_rope_kernel(%arg0: i32, %arg1: i32, %arg2: i32, %arg3: memref<1x16x128xf32, #tpu.memory_space<vmem>>, %arg4: memref<1x16x128xf32, #tpu.memory_space<vmem>>, %arg5: memref<1x128xf32, #tpu.memory_space<vmem>>, %arg6: memref<1x128xf32, #tpu.memory_space<vmem>>, %arg7: memref<16x128xf32, #tpu.memory_space<vmem>>, %arg8: memref<16x128xf32, #tpu.memory_space<vmem>>, %arg9: memref<1x16x128xf32, #tpu.memory_space<vmem>>, %arg10: memref<1x16x128xf32, #tpu.memory_space<vmem>>) attributes {dimension_semantics = [#tpu.dimension_semantics<parallel>, #tpu.dimension_semantics<parallel>, #tpu.dimension_semantics<parallel>], iteration_bounds = array<i64: 2, 2, 1>, scalar_prefetch = 0 : i64, scratch_operands = 0 : i64, tpu.core_type = #tpu.core_type<tc>, window_params = [{transform_indices = @transform_0, window_bounds = array<i64: 1, 16, 128>}, {transform_indices = @transform_1, window_bounds = array<i64: 1, 16, 128>}, {pipeline_mode = #tpu.pipeline_mode<synchronous>, transform_indices = @transform_2, window_bounds = array<i64: 1, 128>}, {pipeline_mode = #tpu.pipeline_mode<synchronous>, transform_indices = @transform_3, window_bounds = array<i64: 1, 128>}, {transform_indices = @transform_4, window_bounds = array<i64: 16, 128>}, {transform_indices = @transform_5, window_bounds = array<i64: 16, 128>}, {transform_indices = @transform_6, window_bounds = array<i64: 1, 16, 128>}, {transform_indices = @transform_7, window_bounds = array<i64: 1, 16, 128>}]} {
    %c0 = arith.constant 0 : index
    %c0_0 = arith.constant 0 : index
    %c0_1 = arith.constant 0 : index
    %0 = vector.load %arg3[%c0, %c0_0, %c0_1] : memref<1x16x128xf32, #tpu.memory_space<vmem>>, vector<1x16x128xf32>
    %1 = vector.shape_cast %0 : vector<1x16x128xf32> to vector<16x128xf32>
    %c0_2 = arith.constant 0 : index
    %c0_3 = arith.constant 0 : index
    %c0_4 = arith.constant 0 : index
    %2 = vector.load %arg4[%c0_2, %c0_3, %c0_4] : memref<1x16x128xf32, #tpu.memory_space<vmem>>, vector<1x16x128xf32>
    %3 = vector.shape_cast %2 : vector<1x16x128xf32> to vector<16x128xf32>
    %c0_5 = arith.constant 0 : index
    %c0_6 = arith.constant 0 : index
    %4 = vector.load %arg5[%c0_5, %c0_6] : memref<1x128xf32, #tpu.memory_space<vmem>>, vector<1x128xf32>
    %c0_7 = arith.constant 0 : index
    %c0_8 = arith.constant 0 : index
    %5 = vector.load %arg6[%c0_7, %c0_8] : memref<1x128xf32, #tpu.memory_space<vmem>>, vector<1x128xf32>
    %c0_9 = arith.constant 0 : index
    %c0_10 = arith.constant 0 : index
    %6 = vector.load %arg7[%c0_9, %c0_10] : memref<16x128xf32, #tpu.memory_space<vmem>>, vector<16x128xf32>
    %c0_11 = arith.constant 0 : index
    %c0_12 = arith.constant 0 : index
    %7 = vector.load %arg8[%c0_11, %c0_12] : memref<16x128xf32, #tpu.memory_space<vmem>>, vector<16x128xf32>
    %8 = arith.mulf %1, %1 : vector<16x128xf32>
    %cst = arith.constant dense<0.000000e+00> : vector<16xf32>
    %9 = vector.multi_reduction <add>, %8, %cst [1] : vector<16x128xf32> to vector<16xf32>
    %10 = vector.shape_cast %9 : vector<16xf32> to vector<16x1xf32>
    %cst_13 = arith.constant 7.812500e-03 : f32
    %11 = vector.broadcast %cst_13 : f32 to vector<16x1xf32>
    %12 = arith.mulf %10, %11 : vector<16x1xf32>
    %13 = arith.mulf %3, %3 : vector<16x128xf32>
    %cst_14 = arith.constant dense<0.000000e+00> : vector<16xf32>
    %14 = vector.multi_reduction <add>, %13, %cst_14 [1] : vector<16x128xf32> to vector<16xf32>
    %15 = vector.shape_cast %14 : vector<16xf32> to vector<16x1xf32>
    %cst_15 = arith.constant 7.812500e-03 : f32
    %16 = vector.broadcast %cst_15 : f32 to vector<16x1xf32>
    %17 = arith.mulf %15, %16 : vector<16x1xf32>
    %cst_16 = arith.constant 9.99999997E-7 : f32
    %18 = vector.broadcast %cst_16 : f32 to vector<16x1xf32>
    %19 = arith.addf %12, %18 : vector<16x1xf32>
    %20 = math.rsqrt %19 : vector<16x1xf32>
    %21 = vector.broadcast %20 : vector<16x1xf32> to vector<16x128xf32>
    %22 = arith.mulf %1, %21 : vector<16x128xf32>
    %23 = vector.broadcast %4 : vector<1x128xf32> to vector<16x128xf32>
    %24 = arith.mulf %22, %23 : vector<16x128xf32>
    %cst_17 = arith.constant 9.99999997E-7 : f32
    %25 = vector.broadcast %cst_17 : f32 to vector<16x1xf32>
    %26 = arith.addf %17, %25 : vector<16x1xf32>
    %27 = math.rsqrt %26 : vector<16x1xf32>
    %28 = vector.broadcast %27 : vector<16x1xf32> to vector<16x128xf32>
    %29 = arith.mulf %3, %28 : vector<16x128xf32>
    %30 = vector.broadcast %5 : vector<1x128xf32> to vector<16x128xf32>
    %31 = arith.mulf %29, %30 : vector<16x128xf32>
    %32 = tpu.iota {dimensions = array<i32: 1>} : vector<16x128xi32>
    %c2_i32 = arith.constant 2 : i32
    %c0_i32 = arith.constant 0 : i32
    %33 = arith.cmpi eq, %c2_i32, %c0_i32 : i32
    %c1_i32 = arith.constant 1 : i32
    %34 = arith.select %33, %c1_i32, %c2_i32 : i32
    %35 = vector.broadcast %34 : i32 to vector<16x128xi32>
    %36 = arith.remsi %32, %35 : vector<16x128xi32>
    %c0_i32_18 = arith.constant 0 : i32
    %37 = vector.broadcast %c0_i32_18 : i32 to vector<16x128xi32>
    %38 = arith.cmpi ne, %36, %37 : vector<16x128xi32>
    %c0_i32_19 = arith.constant 0 : i32
    %39 = vector.broadcast %c0_i32_19 : i32 to vector<16x128xi32>
    %40 = arith.cmpi slt, %36, %39 : vector<16x128xi32>
    %c0_i32_20 = arith.constant 0 : i32
    %41 = arith.cmpi slt, %34, %c0_i32_20 : i32
    %42 = vector.broadcast %41 : i1 to vector<16x128xi1>
    %43 = vector.broadcast %42 : vector<16x128xi1> to vector<16x128xi1>
    %44 = arith.xori %40, %43 : vector<16x128xi1>
    %45 = arith.andi %44, %38 : vector<16x128xi1>
    %46 = vector.broadcast %34 : i32 to vector<16x128xi32>
    %47 = arith.addi %36, %46 : vector<16x128xi32>
    %48 = arith.select %45, %47, %36 : vector<16x128xi1>, vector<16x128xi32>
    %c0_i32_21 = arith.constant 0 : i32
    %49 = vector.broadcast %c0_i32_21 : i32 to vector<16x128xi32>
    %50 = arith.cmpi eq, %48, %49 : vector<16x128xi32>
    %51 = arith.mulf %6, %24 : vector<16x128xf32>
    %c127_i32 = arith.constant 127 : i32
    %52 = tpu.dynamic_rotate %24 by %c127_i32 dim 1 : vector<16x128xf32>, i32 -> vector<16x128xf32>
    %c1_i32_22 = arith.constant 1 : i32
    %53 = tpu.dynamic_rotate %24 by %c1_i32_22 dim 1 : vector<16x128xf32>, i32 -> vector<16x128xf32>
    %54 = arith.select %50, %52, %53 : vector<16x128xi1>, vector<16x128xf32>
    %55 = arith.mulf %7, %54 : vector<16x128xf32>
    %56 = arith.addf %51, %55 : vector<16x128xf32>
    %c0_23 = arith.constant 0 : index
    %c0_24 = arith.constant 0 : index
    %c0_25 = arith.constant 0 : index
    %57 = vector.load %arg9[%c0_23, %c0_24, %c0_25] : memref<1x16x128xf32, #tpu.memory_space<vmem>>, vector<1x16x128xf32>
    %58 = vector.shape_cast %57 : vector<1x16x128xf32> to vector<16x128xf32>
    %59 = vector.shape_cast %56 : vector<16x128xf32> to vector<1x16x128xf32>
    tpu.vector_store %arg9[%c0_23, %c0_24, %c0_25], %59 {strides = array<i32>} : memref<1x16x128xf32, #tpu.memory_space<vmem>>, vector<1x16x128xf32>,
    %60 = arith.mulf %6, %31 : vector<16x128xf32>
    %c127_i32_26 = arith.constant 127 : i32
    %61 = tpu.dynamic_rotate %31 by %c127_i32_26 dim 1 : vector<16x128xf32>, i32 -> vector<16x128xf32>
    %c1_i32_27 = arith.constant 1 : i32
    %62 = tpu.dynamic_rotate %31 by %c1_i32_27 dim 1 : vector<16x128xf32>, i32 -> vector<16x128xf32>
    %63 = arith.select %50, %61, %62 : vector<16x128xi1>, vector<16x128xf32>
    %64 = arith.mulf %7, %63 : vector<16x128xf32>
    %65 = arith.addf %60, %64 : vector<16x128xf32>
    %c0_28 = arith.constant 0 : index
    %c0_29 = arith.constant 0 : index
    %c0_30 = arith.constant 0 : index
    %66 = vector.load %arg10[%c0_28, %c0_29, %c0_30] : memref<1x16x128xf32, #tpu.memory_space<vmem>>, vector<1x16x128xf32>
    %67 = vector.shape_cast %66 : vector<1x16x128xf32> to vector<16x128xf32>
    %68 = vector.shape_cast %65 : vector<16x128xf32> to vector<1x16x128xf32>
    tpu.vector_store %arg10[%c0_28, %c0_29, %c0_30], %68 {strides = array<i32>} : memref<1x16x128xf32, #tpu.memory_space<vmem>>, vector<1x16x128xf32>,
    return
  }
  func.func @transform_0(%arg0: i32, %arg1: i32, %arg2: i32) -> (i32, i32, i32) {
    %c0_i32 = arith.constant 0 : i32
    return %arg0, %arg2, %arg1 : i32, i32, i32
  }
  func.func @transform_1(%arg0: i32, %arg1: i32, %arg2: i32) -> (i32, i32, i32) {
    %c2_i32 = arith.constant 2 : i32
    %0 = arith.addi %c2_i32, %arg1 : i32
    %c0_i32 = arith.constant 0 : i32
    return %arg0, %arg2, %0 : i32, i32, i32
  }
  func.func @transform_2(%arg0: i32, %arg1: i32, %arg2: i32) -> (i32, i32) {
    %c0_i32 = arith.constant 0 : i32
    %c0_i32_0 = arith.constant 0 : i32
    %c0_i32_1 = arith.constant 0 : i32
    return %c0_i32, %c0_i32_0 : i32, i32
  }
  func.func @transform_3(%arg0: i32, %arg1: i32, %arg2: i32) -> (i32, i32) {
    %c0_i32 = arith.constant 0 : i32
    %c0_i32_0 = arith.constant 0 : i32
    %c0_i32_1 = arith.constant 0 : i32
    return %c0_i32, %c0_i32_0 : i32, i32
  }
  func.func @transform_4(%arg0: i32, %arg1: i32, %arg2: i32) -> (i32, i32) {
    %c0_i32 = arith.constant 0 : i32
    %c0_i32_0 = arith.constant 0 : i32
    return %arg2, %c0_i32 : i32, i32
  }
  func.func @transform_5(%arg0: i32, %arg1: i32, %arg2: i32) -> (i32, i32) {
    %c0_i32 = arith.constant 0 : i32
    %c0_i32_0 = arith.constant 0 : i32
    return %arg2, %c0_i32 : i32, i32
  }
  func.func @transform_6(%arg0: i32, %arg1: i32, %arg2: i32) -> (i32, i32, i32) {
    %c0_i32 = arith.constant 0 : i32
    return %arg0, %arg2, %arg1 : i32, i32, i32
  }
  func.func @transform_7(%arg0: i32, %arg1: i32, %arg2: i32) -> (i32, i32, i32) {
    %c0_i32 = arith.constant 0 : i32
    return %arg0, %arg2, %arg1 : i32, i32, i32
  }
}

</mosaic_0001>

<bundles_post_ra>
// kernel: double_stream_block.7
= control target key start
LH: loop header
LB: loop body
LE: loop exit
PB: predicated region body
PF: predicated region fallthrough
CT: control target
= control target key end

     0   :  { %s491_s12 = smov 0   ;;  %s493_s13 = smov 0   ;;  %s538_s0 = inlined_call_operand.vmem [shape: f32[2,8,256], index: 0, kind: input, shape index: {}]   ;;  %s539_s1 = inlined_call_operand.vmem [shape: f32[2,1,256], index: 1, kind: input, shape index: {}]   ;;  %s540_s2 = inlined_call_operand.vmem [shape: f32[2,1,256], index: 2, kind: input, shape index: {}]   ;;  %s541_s3 = inlined_call_operand.vmem [shape: f32[2,8,256], index: 3, kind: output, shape index: {}]  }
   0x1   :  { %s495_s14 = smov 0  }
   0x2 LB: > { %s25_s15 = sadd.s32 1, %s465_s13  ;;  %p410_p0 = scmp.ge.s32.totalorder %s469_s14, 1  ;;  %s469_s14 = sphi %s495_s14, %s13_s14   ;;  %s465_s13 = sphi %s493_s13, %s543_s13   ;;  %s461_s12 = sphi %s491_s12, %s542_s12  }
   0x3   : > { %p27_p1 = scmp.ge.s32.totalorder %s25_s15, 2  ;;  %p175_p2 = scmp.lt.s32.totalorder %s469_s14, 3 }
   0x5   : > { %s545_s15 = smov (%p27_p1, %s25_s15), 0  ;;  %p176_p3 = pnand %p410_p0, %p175_p2 }
   0x6   : > { %p215_p4 = scmp.lt.s32.totalorder (!%p176_p3), %s461_s12, 1  ;;  %v263_v12 = vlaneseq (!%p176_p3) }
   0x7   : > { %179 = sbr.rel (%p176_p3) target bundleno = 334 (0x14e), region = 32 }
   0x8   : > { %v264_v14 = vshrl.u32 (!%p176_p3), %v263_v12, 7 }
   0xa   : > { %v265_v17 = vsub.s32 (!%p176_p3), 0, %v264_v14  ;;  %v269_v18 = vsub.s32 (!%p176_p3), 1, %v264_v14 }
   0xe   : > { %s547_s12 = smov (!%p215_p4, %s461_s12), 1 }
   0xf   : > { %s419_s16 = sshll.u32 %s547_s12, 4  ;;  %s413_s20 = sshll.u32 %s547_s12, 1 }
  0x10   : > { %s223_s19 = scalar_lea.vmem %s538_s0, %s419_s16  ;;  %s231_s23 = scalar_lea.vmem %s540_s2, %s413_s20 }
  0x11   : > { %v241_v0 = vld [vmem:[%s223_s19] sm:$0xff]  ;;  %v242_v1 = vld [vmem:[%s223_s19 + $0x8] sm:$0xff]  ;;  %s227_s26 = scalar_lea.vmem %s539_s1, %s413_s20  ;;  %s240_s29 = scalar_lea.vmem %s541_s3, %s419_s16 }
  0x12   : > { %v243_v2 = vadd.f32 %v242_v1, %v241_v0  ;;  %v260_v15 = vld [vmem:[%s231_s23] sm:$0x3] }
  0x13   : > { %v261_v16 = vadd.f32 1.0, %v260_v15  ;;  %v259_v19 = vld [vmem:[%s227_s26] sm:$0x3] }
  0x14   : > { %244 = vadd.xlane.f32.xlu0 %v243_v2  ;;  %v279_v23 = vrot.slane %v259_v19, %v265_v17  ;;  %v283_v24 = vrot.slane %v259_v19, %v269_v18 }
  0x15   : > { %v266_v20 = vrot.slane %v261_v16, %v265_v17  ;;  %v270_v21 = vrot.slane %v261_v16, %v269_v18 }
  0xa1   : > { %v245_v3 = vpop.xlane.xlu0 %244 }
  0xa2   : > { %v246_v4 = vmul.f32 0.00390625, %v245_v3 }
  0xa4   : > { %v247_v5 = vsub.f32 %v241_v0, %v246_v4  ;;  %v248_v6 = vsub.f32 %v242_v1, %v246_v4 }
  0xa6   : > { %v249_v7 = vmul.f32 %v247_v5, %v247_v5  ;;  %v250_v8 = vmul.f32 %v248_v6, %v248_v6 }
  0xa8   : > { %v251_v9 = vadd.f32 %v250_v8, %v249_v7 }
  0xaa   : > { %252 = vadd.xlane.f32.xlu0 %v251_v9 }
 0x137   : > { %v253_v10 = vpop.xlane.xlu0 %252 }
 0x138   : > { %v254_v11 = vmul.f32 0.00390625, %v253_v10 }
 0x13a   : > { %v255_v13 = vadd.f32 1e-06, %v254_v11 }
 0x13c   : > { %445 = vrsqrt.f32 %v255_v13 }
 0x146   : > { %v446_v22 = vpop.eup %445 }
 0x147   : > { %v257_v25 = vmul.f32 %v446_v22, %v247_v5  ;;  %v258_v26 = vmul.f32 %v446_v22, %v248_v6 }
 0x149   : > { %v273_v27 = vmul.f32 %v266_v20, %v257_v25  ;;  %v274_v28 = vmul.f32 %v270_v21, %v258_v26 }
 0x14b   : > { %v286_v29 = vadd.f32 %v279_v23, %v273_v27  ;;  %v287_v30 = vadd.f32 %v283_v24, %v274_v28 }
 0x14d   : > { %288 = vst [vmem:[%s240_s29] sm:$0xff] %v286_v29  ;;  %289 = vst [vmem:[%s240_s29 + $0x8] sm:$0xff] %v287_v30 }
 0x14e PF: > { %s13_s14 = sadd.s32 1, %s469_s14   ;;  %s542_s12 = smov %s465_s13 }
 0x14f   : > { %p10_p5 = scmp.ge.s32.totalorder %s13_s14, 4   ;;  %s543_s13 = smov %s545_s15 }
 0x151   :  { %12 = sbr.rel (!%p10_p5) target bundleno = 2 (0x2), region = 68 }

// kernel: double_stream_block.6
= control target key start
LH: loop header
LB: loop body
LE: loop exit
PB: predicated region body
PF: predicated region fallthrough
CT: control target
= control target key end

     0   :  { %s529_s12 = smov 0   ;;  %s531_s13 = smov 0   ;;  %s576_s0 = inlined_call_operand.vmem [shape: f32[2,16,256], index: 0, kind: input, shape index: {}]   ;;  %s577_s1 = inlined_call_operand.vmem [shape: f32[2,1,256], index: 1, kind: input, shape index: {}]   ;;  %s578_s2 = inlined_call_operand.vmem [shape: f32[2,1,256], index: 2, kind: input, shape index: {}]   ;;  %s579_s3 = inlined_call_operand.vmem [shape: f32[2,16,256], index: 3, kind: output, shape index: {}]  }
   0x1   :  { %s533_s14 = smov 0  }
   0x2 LB: > { %s25_s15 = sadd.s32 1, %s503_s13  ;;  %p446_p0 = scmp.ge.s32.totalorder %s507_s14, 1  ;;  %s507_s14 = sphi %s533_s14, %s13_s14   ;;  %s503_s13 = sphi %s531_s13, %s581_s13   ;;  %s499_s12 = sphi %s529_s12, %s580_s12  }
   0x3   : > { %p27_p1 = scmp.ge.s32.totalorder %s25_s15, 2  ;;  %p177_p2 = scmp.lt.s32.totalorder %s507_s14, 3 }
   0x5   : > { %s583_s15 = smov (%p27_p1, %s25_s15), 0  ;;  %p178_p3 = pnand %p446_p0, %p177_p2 }
   0x6   : > { %p220_p4 = scmp.lt.s32.totalorder (!%p178_p3), %s499_s12, 1  ;;  %v289_v22 = vlaneseq (!%p178_p3) }
   0x7   : > { %181 = sbr.rel (%p178_p3) target bundleno = 338 (0x152), region = 32 }
   0x8   : > { %v290_v26 = vshrl.u32 (!%p178_p3), %v289_v22, 7 }
   0xa   : > { %v291_v30 = vsub.s32 (!%p178_p3), 0, %v290_v26  ;;  %v295_v31 = vsub.s32 (!%p178_p3), 1, %v290_v26 }
   0xe   : > { %s585_s12 = smov (!%p220_p4, %s499_s12), 1 }
   0xf   : > { %s455_s16 = sshll.u32 %s585_s12, 5  ;;  %s449_s20 = sshll.u32 %s585_s12, 1 }
  0x10   : > { %s228_s19 = scalar_lea.vmem %s576_s0, %s455_s16  ;;  %s237_s23 = scalar_lea.vmem %s578_s2, %s449_s20 }
  0x11   : > { %v249_v0 = vld [vmem:[%s228_s19] sm:$0xff]  ;;  %v250_v1 = vld [vmem:[%s228_s19 + $0x8] sm:$0xff]  ;;  %v251_v3 = vld [vmem:[%s228_s19 + $0x10] sm:$0xff]  ;;  %s233_s26 = scalar_lea.vmem %s577_s1, %s449_s20  ;;  %s247_s29 = scalar_lea.vmem %s579_s3, %s455_s16 }
  0x12   : > { %v253_v2 = vadd.f32 %v250_v1, %v249_v0  ;;  %v252_v4 = vld [vmem:[%s228_s19 + $0x18] sm:$0xff]  ;;  %v286_v27 = vld [vmem:[%s237_s23] sm:$0x3] }
  0x13   : > { %v256_v5 = vadd.f32 %v252_v4, %v251_v3  ;;  %v287_v29 = vadd.f32 1.0, %v286_v27  ;;  %v285_v32 = vld [vmem:[%s233_s26] sm:$0x3] }
  0x14   : > { %254 = vadd.xlane.f32.xlu0 %v253_v2  ;;  %v307_v36 = vrot.slane %v285_v32, %v291_v30  ;;  %v311_v37 = vrot.slane %v285_v32, %v295_v31 }
  0x15   : > { %v292_v33 = vrot.slane %v287_v29, %v291_v30  ;;  %v296_v34 = vrot.slane %v287_v29, %v295_v31 }
  0x18   : > { %257 = vadd.xlane.f32.xlu0 %v256_v5 }
  0xa1   : > { %v255_v6 = vpop.xlane.xlu0 %254 }
  0xa2   : > { %v259_v7 = vmul.f32 0.00390625, %v255_v6 }
  0xa4   : > { %v261_v8 = vsub.f32 %v249_v0, %v259_v7  ;;  %v262_v9 = vsub.f32 %v250_v1, %v259_v7 }
  0xa5   : > { %v258_v10 = vpop.xlane.xlu0 %257 }
  0xa6   : > { %v260_v11 = vmul.f32 0.00390625, %v258_v10  ;;  %v265_v12 = vmul.f32 %v261_v8, %v261_v8  ;;  %v266_v13 = vmul.f32 %v262_v9, %v262_v9 }
  0xa8   : > { %v263_v14 = vsub.f32 %v251_v3, %v260_v11  ;;  %v264_v15 = vsub.f32 %v252_v4, %v260_v11  ;;  %v269_v16 = vadd.f32 %v266_v13, %v265_v12 }
  0xaa   : > { %270 = vadd.xlane.f32.xlu1 %v269_v16  ;;  %v267_v17 = vmul.f32 %v263_v14, %v263_v14  ;;  %v268_v18 = vmul.f32 %v264_v15, %v264_v15 }
  0xac   : > { %v272_v19 = vadd.f32 %v268_v18, %v267_v17 }
  0xae   : > { %273 = vadd.xlane.f32.xlu1 %v272_v19 }
 0x137   : > { %v271_v20 = vpop.xlane.xlu1 %270 }
 0x138   : > { %v275_v21 = vmul.f32 0.00390625, %v271_v20 }
 0x13a   : > { %v277_v23 = vadd.f32 1e-06, %v275_v21 }
 0x13b   : > { %v274_v24 = vpop.xlane.xlu1 %273 }
 0x13c   : > { %481 = vrsqrt.f32 %v277_v23  ;;  %v276_v25 = vmul.f32 0.00390625, %v274_v24 }
 0x13e   : > { %v278_v28 = vadd.f32 1e-06, %v276_v25 }
 0x140   : > { %483 = vrsqrt.f32 %v278_v28 }
 0x146   : > { %v482_v35 = vpop.eup %481 }
 0x147   : > { %v281_v38 = vmul.f32 %v482_v35, %v261_v8  ;;  %v282_v39 = vmul.f32 %v482_v35, %v262_v9 }
 0x149   : > { %v299_v40 = vmul.f32 %v292_v33, %v281_v38  ;;  %v300_v41 = vmul.f32 %v296_v34, %v282_v39 }
 0x14a   : > { %v484_v42 = vpop.eup %483 }
 0x14b   : > { %v314_v43 = vadd.f32 %v307_v36, %v299_v40  ;;  %v315_v44 = vadd.f32 %v311_v37, %v300_v41  ;;  %v283_v45 = vmul.f32 %v484_v42, %v263_v14  ;;  %v284_v46 = vmul.f32 %v484_v42, %v264_v15 }
 0x14d   : > { %318 = vst [vmem:[%s247_s29] sm:$0xff] %v314_v43  ;;  %319 = vst [vmem:[%s247_s29 + $0x8] sm:$0xff] %v315_v44  ;;  %v301_v47 = vmul.f32 %v292_v33, %v283_v45  ;;  %v302_v48 = vmul.f32 %v296_v34, %v284_v46 }
 0x14f   : > { %v316_v49 = vadd.f32 %v307_v36, %v301_v47  ;;  %v317_v50 = vadd.f32 %v311_v37, %v302_v48 }
 0x151   : > { %320 = vst [vmem:[%s247_s29 + $0x10] sm:$0xff] %v316_v49  ;;  %321 = vst [vmem:[%s247_s29 + $0x18] sm:$0xff] %v317_v50 }
 0x152 PF: > { %s13_s14 = sadd.s32 1, %s507_s14   ;;  %s580_s12 = smov %s503_s13 }
 0x153   : > { %p10_p5 = scmp.ge.s32.totalorder %s13_s14, 4   ;;  %s581_s13 = smov %s583_s15 }
 0x155   :  { %12 = sbr.rel (!%p10_p5) target bundleno = 2 (0x2), region = 68 }

// kernel: double_stream_block.9
= control target key start
LH: loop header
LB: loop body
LE: loop exit
PB: predicated region body
PF: predicated region fallthrough
CT: control target
= control target key end

     0   :  { %s900_s24 = smov 0   ;;  %s902_s25 = smov 0   ;;  %s980_s0 = inlined_call_operand.vmem [shape: f32[2,8,768], index: 0, kind: input, shape index: {}, may-alias: {0,1}]   ;;  %s981_s1 = inlined_call_operand.vmem [shape: f32[2,8,768], index: 1, kind: input, shape index: {}, may-alias: {0,1}]   ;;  %s982_s2 = inlined_call_operand.vmem [shape: f32[1,128], index: 2, kind: input, shape index: {}]   ;;  %s983_s3 = inlined_call_operand.vmem [shape: f32[1,128], index: 3, kind: input, shape index: {}]   ;;  %s984_s4 = inlined_call_operand.vmem [shape: f32[8,128], index: 4, kind: input, shape index: {}]   ;;  %s985_s5 = inlined_call_operand.vmem [shape: f32[8,128], index: 5, kind: input, shape index: {}]   ;;  %s986_s6 = inlined_call_operand.vmem [shape: f32[2,8,256], index: 6, kind: output, shape index: {0}]   ;;  %s987_s7 = inlined_call_operand.vmem [shape: f32[2,8,256], index: 7, kind: output, shape index: {1}]  }
   0x1   :  { %s904_s26 = smov 0   ;;  %s906_s27 = smov 0  }
   0x2   :  { %s908_s28 = smov 0  }
   0x3 LB: > { %s33_s29 = sadd.s32 1, %s848_s26  ;;  %s37_s30 = sadd.s32 1, %s852_s27  ;;  %s856_s28 = sphi %s908_s28, %s18_s28   ;;  %s852_s27 = sphi %s906_s27, %s991_s27   ;;  %s848_s26 = sphi %s904_s26, %s990_s26   ;;  %s844_s25 = sphi %s902_s25, %s989_s25   ;;  %s840_s24 = sphi %s900_s24, %s988_s24  }
   0x4   : > { %p35_p0 = scmp.ge.s32.totalorder %s33_s29, 2  ;;  %p760_p1 = scmp.ge.s32.totalorder %s856_s28, 1 }
   0x5   : > { %p321_p2 = scmp.lt.s32.totalorder %s856_s28, 5 }
   0x6   : > { %s993_s29 = smov (%p35_p0, %s33_s29), 0  ;;  %s995_s30 = smov (!%p35_p0, %s37_s30), %s852_s27 }
   0x7   : > { %p322_p3 = pnand %p760_p1, %p321_p2  ;;  %p39_p4 = scmp.ge.s32.totalorder %s995_s30, 2 }
   0x8   : > { %p400_p5 = scmp.lt.s32.totalorder (!%p322_p3), %s844_s25, 1  ;;  %p404_p6 = scmp.lt.s32.totalorder (!%p322_p3), %s840_s24, 5  ;;  %v767_v11 = vld [vmem:[%s982_s2] ss:$0 sm:$0xff] (!%p322_p3)  ;;  %v492_v18 = vlaneseq (!%p322_p3) }
   0x9   : > { %s997_s30 = smov (%p39_p4, %s995_s30), 0  ;;  %325 = sbr.rel (%p322_p3) target bundleno = 316 (0x13c), region = 44 }
   0xa   : > { %s412_s8 = sadd.s32 (!%p322_p3), 2, %s840_s24  ;;  %s858_s23 = smov (!%p322_p3), 127   ;;  %v768_v15 = vld [vmem:[%s983_s3] ss:$0 sm:$0xff] (!%p322_p3)  ;;  %v493_v19 = vand.u32 (!%p322_p3), 127, %v492_v18 }
   0xb   : > { %p417_p7 = scmp.lt.s32.totalorder (!%p322_p3), %s412_s8, 5  ;;  %p438_p8 = scmp.lt.s32.totalorder (!%p322_p3), %s840_s24, 1  ;;  %v462_v22 = vld [vmem:[%s984_s4] sm:$0xff] (!%p322_p3) }
   0xc   : > { %v498_v20 = vand.u32 (!%p322_p3), 1, %v493_v19  ;;  %v463_v23 = vld [vmem:[%s985_s5] sm:$0xff] (!%p322_p3) }
   0xe   : > { %vm506_vm0 = vcmp.eq.s32.totalorder (!%p322_p3), %v498_v20, 0 }
  0x10   : > { %s999_s25 = smov (!%p400_p5, %s844_s25), 1  ;;  %s1001_s8 = smov (!%p417_p7, %s412_s8), 5 }
  0x11   : > { %s405_s9 = scalar_select %p404_p6, %s840_s24, 5 }
  0x12   : > { %s771_s10 = smul.u32 6, %s999_s25  ;;  %s1003_s24 = smov (!%p438_p8, %s840_s24), 1 }
  0x14   : > { %s409_s11 = sadd.s32 %s771_s10, %s405_s9  ;;  %s422_s16 = sadd.s32 %s771_s10, %s1001_s8 }
  0x15   : > { %s761_s12 = sshll.u32 %s409_s11, 3  ;;  %s762_s17 = sshll.u32 %s422_s16, 3 }
  0x16   : > { %s411_s15 = scalar_lea.vmem %s980_s0, %s761_s12  ;;  %s424_s20 = scalar_lea.vmem %s981_s1, %s762_s17 }
  0x17   : > { %v458_v0 = vld [vmem:[%s411_s15] sm:$0xff]  ;;  %s859_s10 = smov 1   ;;  %s763_s11 = sshll.u32 %s999_s25, 1 }
  0x18   : > { %v464_v1 = vmul.f32 %v458_v0, %v458_v0  ;;  %v459_v2 = vld [vmem:[%s424_s20] sm:$0xff]  ;;  %s443_s12 = sadd.s32 %s763_s11, %s1003_s24 }
  0x19   : > { %v468_v3 = vmul.f32 %v459_v2, %v459_v2  ;;  %s764_s17 = sshll.u32 %s443_s12, 3 }
  0x1a   : > { %465 = vadd.xlane.f32.xlu0 %v464_v1  ;;  %s445_s19 = scalar_lea.vmem %s986_s6, %s764_s17  ;;  %s457_s21 = scalar_lea.vmem %s987_s7, %s764_s17 }
  0x1e   : > { %469 = vadd.xlane.f32.xlu0 %v468_v3 }
  0xa7   : > { %v466_v4 = vpop.xlane.xlu0 %465 }
  0xa8   : > { %v467_v5 = vmul.f32 0.0078125, %v466_v4 }
  0xaa   : > { %v472_v6 = vadd.f32 1e-06, %v467_v5 }
  0xab   : > { %v470_v7 = vpop.xlane.xlu0 %469 }
  0xac   : > { %814 = vrsqrt.f32 %v472_v6  ;;  %v471_v8 = vmul.f32 0.0078125, %v470_v7 }
  0xae   : > { %v482_v9 = vadd.f32 1e-06, %v471_v8 }
  0xb0   : > { %816 = vrsqrt.f32 %v482_v9 }
  0xb6   : > { %v815_v10 = vpop.eup %814 }
  0xb7   : > { %v474_v12 = vmul.f32 %v815_v10, %v458_v0 }
  0xb9   : > { %v481_v13 = vmul.f32 %v767_v11, %v474_v12 }
  0xba   : > { %v817_v14 = vpop.eup %816 }
  0xbb   : > { %508 = vrot.lane.b32.xlu1 %v481_v13, %s858_s23  ;;  %v484_v16 = vmul.f32 %v817_v14, %v459_v2  ;;  %v507_v26 = vmul.f32 %v481_v13, %v462_v22 }
  0xbd   : > { %v491_v17 = vmul.f32 %v768_v15, %v484_v16 }
  0xbf   : > { %510 = vrot.lane.b32.xlu1 %v481_v13, %s859_s10  ;;  %517 = vrot.lane.b32.xlu0 %v491_v17, %s858_s23  ;;  %v516_v32 = vmul.f32 %v491_v17, %v462_v22 }
  0xc3   : > { %519 = vrot.lane.b32.xlu1 %v491_v17, %s859_s10 }
 0x12d   : > { %v509_v21 = vpop.permute.xlu1 %508 }
 0x131   : > { %v511_v24 = vpop.permute.xlu1 %510  ;;  %v518_v28 = vpop.permute.xlu0 %517 }
 0x132   : > { %v512_v25 = vsel %vm506_vm0, %v509_v21, %v511_v24 }
 0x133   : > { %v513_v27 = vmul.f32 %v512_v25, %v463_v23 }
 0x135   : > { %v514_v29 = vadd.f32 %v513_v27, %v507_v26  ;;  %v520_v30 = vpop.permute.xlu1 %519 }
 0x136   : > { %v521_v31 = vsel %vm506_vm0, %v518_v28, %v520_v30 }
 0x137   : > { %515 = vst [vmem:[%s445_s19] sm:$0xff] %v514_v29  ;;  %v522_v33 = vmul.f32 %v521_v31, %v463_v23 }
 0x139   : > { %v523_v34 = vadd.f32 %v522_v33, %v516_v32 }
 0x13b   : > { %524 = vst [vmem:[%s457_s21] sm:$0xff] %v523_v34 }
 0x13c PF: > { %s18_s28 = sadd.s32 1, %s856_s28   ;;  %s988_s24 = smov %s848_s26 }
 0x13d   : > { %p15_p9 = scmp.ge.s32.totalorder %s18_s28, 6   ;;  %s989_s25 = smov %s852_s27 }
 0x13e   : > { %s990_s26 = smov %s993_s29  ;;  %s991_s27 = smov %s997_s30 }
 0x13f   :  { %17 = sbr.rel (!%p15_p9) target bundleno = 3 (0x3), region = 95 }

// kernel: double_stream_block.8
= control target key start
LH: loop header
LB: loop body
LE: loop exit
PB: predicated region body
PF: predicated region fallthrough
CT: control target
= control target key end

     0   :  { %s1257_s0 = inlined_call_operand.vmem [shape: f32[2,16,768], index: 0, kind: input, shape index: {}, may-alias: {0,1}]   ;;  %s1258_s1 = inlined_call_operand.vmem [shape: f32[2,16,768], index: 1, kind: input, shape index: {}, may-alias: {0,1}]   ;;  %s1259_s2 = inlined_call_operand.vmem [shape: f32[1,128], index: 2, kind: input, shape index: {}]   ;;  %s1260_s3 = inlined_call_operand.vmem [shape: f32[1,128], index: 3, kind: input, shape index: {}]   ;;  %s1261_s4 = inlined_call_operand.vmem [shape: f32[16,128], index: 4, kind: input, shape index: {}]   ;;  %s1262_s5 = inlined_call_operand.vmem [shape: f32[16,128], index: 5, kind: input, shape index: {}]   ;;  %s1263_s6 = inlined_call_operand.vmem [shape: f32[2,16,256], index: 6, kind: output, shape index: {0}]   ;;  %s1264_s7 = inlined_call_operand.vmem [shape: f32[2,16,256], index: 7, kind: output, shape index: {1}]  }
   0x1   :  { %1267 = sst [smem:[#allocation9_spill]] %s1264_s7 }
   0x2   :  { %s1066_s24 = smov 0   ;;  %s1068_s25 = smov 0  }
   0x3   :  { %s1070_s26 = smov 0   ;;  %s1072_s27 = smov 0  }
   0x4   :  { %s1074_s28 = smov 0   ;;  %s1076_s29 = smov 0  }
   0x5   :  { %s1078_s30 = smov 0   ;;  %s1080_s8 = smov 0  }
   0x6   :  { %s1082_s9 = smov 0  }
   0x7 LB: > { %s842_s10 = sadd.s32 4294967295, %s1022_s9   ;;  %s33_s11 = sadd.s32 1, %s1014_s30  ;;  %s1022_s9 = sphi %s1082_s9, %s18_s9   ;;  %s1018_s8 = sphi %s1080_s8, %s1287_s8   ;;  %s1014_s30 = sphi %s1078_s30, %s1286_s30   ;;  %s1010_s29 = sphi %s1076_s29, %s1285_s29   ;;  %s1006_s28 = sphi %s1074_s28, %s1284_s28   ;;  %s1002_s27 = sphi %s1072_s27, %s1283_s27   ;;  %s998_s26 = sphi %s1070_s26, %s1282_s26   ;;  %s994_s25 = sphi %s1068_s25, %s1281_s25   ;;  %s990_s24 = sphi %s1066_s24, %s1280_s24  }
   0x8   : > { %p35_p0 = scmp.ge.s32.totalorder %s33_s11, 2  ;;  %s37_s12 = sadd.s32 1, %s1018_s8 }
   0x9   : > { %s48_s13 = sadd.s32 1, %s1002_s27  ;;  %p55_p1 = scmp.ne.s32.totalorder %s1002_s27, %s998_s26 }
   0xa   : > { %s1289_s11 = smov (%p35_p0, %s33_s11), 0  ;;  %s1291_s12 = smov (!%p35_p0, %s37_s12), %s1018_s8 }
   0xb   : > { %1268 = sst [smem:[#allocation6_spill]] %s1289_s11  ;;  %s44_s14 = ssub.s32 %s1014_s30, %s1289_s11 }
   0xc   : > { %p56_p2 = scmp.eq.s32.totalorder %s1022_s9, 0  ;;  %p39_p3 = scmp.ge.s32.totalorder %s1291_s12, 2 }
   0xd   : > { %s71_s15 = sadd.s32 2, %s1014_s30  ;;  %s72_s17 = sadd.s32 2, %s1289_s11 }
   0xe   : > { %p1129_p4 = por %p56_p2, %p55_p1  ;;  %s1293_s12 = smov (%p39_p3, %s1291_s12), 0 }
   0xf   : > { %1270 = sst [smem:[#allocation7_spill]] %s1293_s12  ;;  %s76_s18 = ssub.s32 %s71_s15, %s72_s17 }
  0x10   : > { %s80_s19 = sadd.s32 1, %s994_s25  ;;  %s41_s20 = ssub.s32 %s1018_s8, %s1293_s12 }
  0x11   : > { %p87_p5 = scmp.ne.s32.totalorder %s994_s25, %s990_s24  ;;  %s45_s21 = sor.u32 %s44_s14, %s41_s20 }
  0x12   : > { %s77_s22 = sor.u32 %s76_s18, %s41_s20  ;;  %p46_p6 = scmp.eq.s32.totalorder %s45_s21, 0 }
  0x13   : > { %p78_p7 = scmp.eq.s32.totalorder %s77_s22, 0  ;;  %p1143_p8 = por %p87_p5, %p56_p2 }
  0x14   : > { %p215_p9 = scmp.eq.s32.totalorder %s842_s10, 3  ;;  %p847_p11 = scmp.ge.s32.totalorder %s1022_s9, 4 }
  0x15   : > { %s1148_s7 = scalar_select %p46_p6, %s1002_s27, %s48_s13  }
  0x16   : > { %s1151_s11 = scalar_select %p78_p7, %s994_s25, %s80_s19  }
  0x17   : > { %1272 = sst [smem:[#allocation8_spill]] %s1148_s7  ;;  %p1156_p10 = por %p215_p9, %p55_p1 }
  0x18   : > { %291 = sbr.rel (%p847_p11) target bundleno = 47 (0x2f), region = 32 }
  0x1f   : > { %294 = sbr.rel (!%p1129_p4) target bundleno = 39 (0x27), region = 36  ;;  %s296_s14 = sand.u32 (%p1129_p4), 1, %s1002_s27  }
  0x20   : > { %s869_s10 = smul.u32 (%p1129_p4), 12, %s1018_s8  ;;  %s848_s13 = sshll.u32 (%p1129_p4), %s296_s14, 4 }
  0x21   : > { %s298_s22 = scalar_lea.vmem (%p1129_p4), [#allocation2], %s848_s13 }
  0x22   : > { %s303_s17 = sadd.s32 (%p1129_p4), %s1014_s30, %s869_s10 }
  0x23   : > { %s849_s18 = sshll.u32 (%p1129_p4), %s303_s17, 3 }
  0x24   : > { %s305_s21 = scalar_lea.vmem (%p1129_p4), %s1257_s0, %s849_s18 }
  0x25   : > { %v335_v0 = vld [vmem:[%s305_s21] sm:$0xff] (%p1129_p4)  ;;  %v337_v1 = vld [vmem:[%s305_s21 + $0x30] sm:$0xff] (%p1129_p4) }
  0x26   : > { %336 = vst [vmem:[%s298_s22] sm:$0xff] %v335_v0  ;;  %338 = vst [vmem:[%s298_s22 + $0x8] sm:$0xff] %v337_v1 }
  0x27 PF: > { %344 = sbr.rel (!%p1143_p8) target bundleno = 47 (0x2f), region = 74  ;;  %s346_s16 = sand.u32 (%p1143_p8), 1, %s994_s25  }
  0x28   : > { %s713_s14 = smul.u32 (%p1143_p8), 12, %s1018_s8  ;;  %s850_s10 = sshll.u32 (%p1143_p8), %s346_s16, 4 }
  0x29   : > { %s348_s13 = scalar_lea.vmem (%p1143_p8), [#allocation3], %s850_s10 }
  0x2a   : > { %s714_s17 = sadd.s32 (%p1143_p8), %s1014_s30, %s713_s14 }
  0x2b   : > { %s851_s12 = sshll.u32 (%p1143_p8), %s714_s17, 3 }
  0x2c   : > { %s716_s18 = scalar_lea.vmem (%p1143_p8), %s1258_s1, %s851_s12 }
  0x2d   : > { %v852_v2 = vld [vmem:[%s716_s18 + $0x10] sm:$0xff] (%p1143_p8)  ;;  %v853_v3 = vld [vmem:[%s716_s18 + $0x40] sm:$0xff] (%p1143_p8) }
  0x2e   : > { %387 = vst [vmem:[%s348_s13] sm:$0xff] %v852_v2  ;;  %389 = vst [vmem:[%s348_s13 + $0x8] sm:$0xff] %v853_v3 }
  0x2f PF: > { %p854_p12 = scmp.ge.s32.totalorder %s1022_s9, 1  ;;  %p394_p13 = scmp.lt.s32.totalorder %s1022_s9, 5 }
  0x31   : > { %p395_p0 = pnand %p854_p12, %p394_p13 }
  0x32   : > { %s401_s23 = sand.u32 (!%p395_p0), 1, %s998_s26   ;;  %s408_s20 = sand.u32 (!%p395_p0), 1, %s990_s24   ;;  %v859_v25 = vld [vmem:[%s1259_s2] ss:$0 sm:$0xff] (!%p395_p0)  ;;  %v527_v38 = vlaneseq (!%p395_p0)  ;;  %v480_v55 = vld [vmem:[%s1261_s4 + $0x8] sm:$0xff] (!%p395_p0) }
  0x33   : > { %398 = sbr.rel (%p395_p0) target bundleno = 367 (0x16f), region = 112  ;;  %s1181_s21 = sshll.u32 (!%p395_p0), %s401_s23, 4  ;;  %v860_v28 = vld [vmem:[%s1260_s3] ss:$0 sm:$0xff] (!%p395_p0)  ;;  %v482_v56 = vld [vmem:[%s1262_s5 + $0x8] sm:$0xff] (!%p395_p0) }
  0x34   : > { %s856_s7 = sshll.u32 (!%p395_p0), %s408_s20, 4  ;;  %s403_s12 = scalar_lea.vmem (!%p395_p0), [#allocation2], %s1181_s21  ;;  %v528_v39 = vand.u32 (!%p395_p0), 127, %v527_v38  ;;  %v479_v45 = vld [vmem:[%s1261_s4] sm:$0xff] (!%p395_p0) }
  0x35   : > { %v473_v4 = vld [vmem:[%s403_s12] sm:$0xff] (!%p395_p0)  ;;  %v474_v5 = vld [vmem:[%s403_s12 + $0x8] sm:$0xff] (!%p395_p0)  ;;  %s410_s22 = scalar_lea.vmem (!%p395_p0), [#allocation3], %s856_s7  ;;  %s1024_s10 = smov (!%p395_p0), 127  }
  0x36   : > { %v483_v6 = vmul.f32 (!%p395_p0), %v473_v4, %v473_v4  ;;  %v475_v7 = vld [vmem:[%s410_s22] sm:$0xff] (!%p395_p0)  ;;  %v476_v8 = vld [vmem:[%s410_s22 + $0x8] sm:$0xff] (!%p395_p0)  ;;  %v484_v10 = vmul.f32 (!%p395_p0), %v474_v5, %v474_v5  ;;  %s1025_s17 = smov (!%p395_p0), 1   ;;  %v533_v41 = vand.u32 (!%p395_p0), 1, %v528_v39  ;;  %s449_s24 = scalar_lea.vmem (!%p395_p0), [#allocation4], %s1181_s21 }
  0x37   : > { %v491_v9 = vmul.f32 (!%p395_p0), %v475_v7, %v475_v7  ;;  %v492_v11 = vmul.f32 (!%p395_p0), %v476_v8, %v476_v8  ;;  %v481_v46 = vld [vmem:[%s1262_s5] sm:$0xff] (!%p395_p0)  ;;  %s455_s26 = scalar_lea.vmem (!%p395_p0), [#allocation5], %s1181_s21 }
  0x38   : > { %485 = vadd.xlane.f32.xlu0 (!%p395_p0), %v483_v6  ;;  %vm1190_vm0 = vcmp.eq.s32.totalorder (!%p395_p0), %v533_v41, 0 }
  0x39   : > { %493 = vadd.xlane.f32.xlu1 (!%p395_p0), %v491_v9 }
  0x3a   : > { %s863_s21 = sshll.u32 (%p1156_p10), %s1010_s29, 2 }
  0x3b   : > { %s593_s16 = sadd.s32 (%p1156_p10), %s1006_s28, %s863_s21 }
  0x3c   : > { %487 = vadd.xlane.f32.xlu0 %v484_v10  ;;  %s864_s14 = sshll.u32 (%p1156_p10), %s593_s16, 3 }
  0x3d   : > { %495 = vadd.xlane.f32.xlu1 %v492_v11  ;;  %s595_s19 = scalar_lea.vmem (%p1156_p10), %s1263_s6, %s864_s14 }
  0xc5   : > { %v486_v12 = vpop.xlane.xlu0 %485 }
  0xc6   : > { %v489_v13 = vmul.f32 0.0078125, %v486_v12  ;;  %v494_v14 = vpop.xlane.xlu1 %493 }
  0xc7   : > { %v497_v15 = vmul.f32 0.0078125, %v494_v14 }
  0xc8   : > { %v499_v16 = vadd.f32 1e-06, %v489_v13 }
  0xc9   : > { %v513_v17 = vadd.f32 1e-06, %v497_v15  ;;  %v488_v18 = vpop.xlane.xlu0 %487 }
  0xca   : > { %944 = vrsqrt.f32 %v499_v16  ;;  %v490_v19 = vmul.f32 0.0078125, %v488_v18  ;;  %v496_v20 = vpop.xlane.xlu1 %495 }
  0xcb   : > { %946 = vrsqrt.f32 %v513_v17  ;;  %v498_v22 = vmul.f32 0.0078125, %v496_v20 }
  0xcc   : > { %v500_v21 = vadd.f32 1e-06, %v490_v19 }
  0xcd   : > { %v514_v23 = vadd.f32 1e-06, %v498_v22 }
  0xce   : > { %948 = vrsqrt.f32 %v500_v21 }
  0xcf   : > { %950 = vrsqrt.f32 %v514_v23 }
  0xd4   : > { %v945_v24 = vpop.eup %944 }
  0xd5   : > { %v947_v26 = vpop.eup %946  ;;  %v503_v27 = vmul.f32 %v945_v24, %v473_v4 }
  0xd6   : > { %v517_v29 = vmul.f32 %v947_v26, %v475_v7 }
  0xd7   : > { %v511_v30 = vmul.f32 %v859_v25, %v503_v27 }
  0xd8   : > { %v949_v31 = vpop.eup %948  ;;  %v525_v32 = vmul.f32 %v860_v28, %v517_v29 }
  0xd9   : > { %544 = vrot.lane.b32.xlu0 %v511_v30, %s1024_s10  ;;  %v504_v33 = vmul.f32 %v949_v31, %v474_v5  ;;  %v951_v35 = vpop.eup %950  ;;  %v542_v51 = vmul.f32 %v511_v30, %v479_v45 }
  0xda   : > { %v518_v36 = vmul.f32 %v951_v35, %v476_v8  ;;  %v560_v53 = vmul.f32 %v525_v32, %v479_v45 }
  0xdb   : > { %v512_v34 = vmul.f32 %v859_v25, %v504_v33 }
  0xdc   : > { %v526_v37 = vmul.f32 %v860_v28, %v518_v36 }
  0xdd   : > { %562 = vrot.lane.b32.xlu0 %v525_v32, %s1024_s10  ;;  %546 = vrot.lane.b32.xlu1 %v512_v34, %s1024_s10  ;;  %v543_v61 = vmul.f32 %v512_v34, %v480_v55 }
  0xde   : > { %v561_v3 = vmul.f32 %v526_v37, %v480_v55 }
  0xe1   : > { %566 = vrot.lane.b32.xlu0 %v525_v32, %s1025_s17  ;;  %548 = vrot.lane.b32.xlu1 %v511_v30, %s1025_s17 }
  0xe5   : > { %550 = vrot.lane.b32.xlu1 %v512_v34, %s1025_s17 }
  0xe9   : > { %564 = vrot.lane.b32.xlu1 %v526_v37, %s1024_s10 }
  0xed   : > { %568 = vrot.lane.b32.xlu1 %v526_v37, %s1025_s17 }
 0x14b   : > { %v545_v40 = vpop.permute.xlu0 %544 }
 0x14f   : > { %v547_v42 = vpop.permute.xlu1 %546  ;;  %v563_v43 = vpop.permute.xlu0 %562 }
 0x153   : > { %v549_v47 = vpop.permute.xlu1 %548  ;;  %v567_v48 = vpop.permute.xlu0 %566 }
 0x154   : > { %v552_v49 = vsel %vm1190_vm0, %v545_v40, %v549_v47  ;;  %v570_v50 = vsel %vm1190_vm0, %v563_v43, %v567_v48 }
 0x155   : > { %v554_v52 = vmul.f32 %v552_v49, %v481_v46  ;;  %v572_v54 = vmul.f32 %v570_v50, %v481_v46 }
 0x157   : > { %v556_v57 = vadd.f32 %v554_v52, %v542_v51  ;;  %v574_v58 = vadd.f32 %v572_v54, %v560_v53  ;;  %v551_v59 = vpop.permute.xlu1 %550 }
 0x158   : > { %v553_v60 = vsel %vm1190_vm0, %v547_v42, %v551_v59 }
 0x159   : > { %558 = vst [vmem:[%s449_s24] sm:$0xff] %v556_v57  ;;  %576 = vst [vmem:[%s455_s26] sm:$0xff] %v574_v58  ;;  %v555_v62 = vmul.f32 %v553_v60, %v482_v56 }
 0x15b   : > { %v557_v63 = vadd.f32 %v555_v62, %v543_v61  ;;  %v565_v0 = vpop.permute.xlu1 %564 }
 0x15d   : > { %559 = vst [vmem:[%s449_s24 + $0x8] sm:$0xff] %v557_v63 }
 0x15f   : > { %v569_v1 = vpop.permute.xlu1 %568  ;;  %588 = sbr.rel (!%p1156_p10) target bundleno = 358 (0x166), region = 124 }
 0x160   : > { %v571_v2 = vsel %vm1190_vm0, %v565_v0, %v569_v1  ;;  %v625_v6 = vld [vmem:[%s449_s24] sm:$0xff] (%p1156_p10) }
 0x161   : > { %v573_v4 = vmul.f32 %v571_v2, %v482_v56  ;;  %626 = vst [vmem:[%s595_s19] sm:$0xff] (%p1156_p10), %v625_v6 }
 0x163   : > { %v575_v5 = vadd.f32 %v573_v4, %v561_v3 }
 0x164   : > { %v627_v7 = vld [vmem:[%s449_s24 + $0x8] sm:$0xff] (%p1156_p10) }
 0x165   : > { %577 = vst [vmem:[%s455_s26 + $0x8] sm:$0xff] %v575_v5  ;;  %628 = vst [vmem:[%s595_s19 + $0x10] sm:$0xff] (%p1156_p10), %v627_v7 }
 0x166 PF: > { %634 = sbr.rel (!%p1156_p10) target bundleno = 367 (0x16f), region = 162  ;;  %s865_s18 = sshll.u32 (%p1156_p10), %s1010_s29, 2  ;;  %v671_v8 = vld [vmem:[%s455_s26] sm:$0xff] (%p1156_p10) }
 0x167   : > { %s639_s13 = sadd.s32 (%p1156_p10), %s1006_s28, %s865_s18  ;;  %s1276_s12 = sld [smem:[#allocation9_spill]] (%p1156_p10) }
 0x168   : > { %s866_s23 = sshll.u32 (%p1156_p10), %s639_s13, 3 }
 0x16c   : > { %v673_v9 = vld [vmem:[%s455_s26 + $0x8] sm:$0xff] (%p1156_p10) }
 0x16d   : > { %s641_s22 = scalar_lea.vmem %s1276_s12, %s866_s23 }
 0x16e   : > { %672 = vst [vmem:[%s641_s22] sm:$0xff] %v671_v8  ;;  %674 = vst [vmem:[%s641_s22 + $0x10] sm:$0xff] %v673_v9 }
 0x16f PF: > { %s18_s9 = sadd.s32 1, %s1022_s9   ;;  %s1277_s15 = sld [smem:[#allocation8_spill]] }
 0x170   : > { %p15_p1 = scmp.ge.s32.totalorder %s18_s9, 6   ;;  %s1278_s21 = sld [smem:[#allocation6_spill]] }
 0x171   : > { %s1279_s16 = sld [smem:[#allocation7_spill]]  ;;  %s1280_s24 = smov %s994_s25 }
 0x172   : > { %s1281_s25 = smov %s1151_s11  ;;  %s1282_s26 = smov %s1002_s27 }
 0x173   : > { %s1284_s28 = smov %s1014_s30  ;;  %s1285_s29 = smov %s1018_s8 }
 0x174   :  { %17 = sbr.rel (!%p15_p1) target bundleno = 7 (0x7), region = 257 }
 0x175   : > { %s1283_s27 = smov %s1277_s15 }
 0x176   : > { %s1286_s30 = smov %s1278_s21 }
 0x177   : > { %s1287_s8 = smov %s1279_s16 }

</bundles_post_ra>
